<compile_context>
chip_gen: v7x
topology: tpu7x:2x2x1
jax: 0.10.0
libtpu: 0.0.40
codegen_flags: <defaults>
</compile_context>

<pallas_src>
import functools

import jax
import jax.numpy as jnp
from jax.experimental import pallas as pl
from jax.experimental.pallas import tpu as pltpu


# ---------------------------------------------------------------------------
# Kernel
# ---------------------------------------------------------------------------
def _traj_kernel(obs_ref, sa_ref, sb_ref, abs_ref, rel_ref,
                 *, obs_len, pred_len, batch, hdim):
    f32 = jnp.float32
    H = hdim
    H4 = 4 * H

    # ---- unpack packed weight slabs (static slices; header is one (8, 4H) tile) ----
    hdr = sa_ref[0:8, :]                     # (8, 4H)
    w_enc = hdr[0:2, :]                      # spatial emb folded into encoder W_ih (2, 4H)
    b_enc = hdr[2:3, :]                      # folded encoder bias                  (1, 4H)
    bhp = hdr[3:4, 0:2]                      # hidden2pos bias                      (1, 2)
    bhp_wdec = hdr[4:5, :]                   # bhp @ w_dec                          (1, 4H)
    b_dec = hdr[5:6, :]                      # folded decoder bias                  (1, 4H)
    w_dec = hdr[6:8, :]                      # spatial emb folded into decoder W_ih (2, 4H)
    wh_enc = sa_ref[8:8 + H, :]              # encoder W_hh                         (H, 4H)

    wb = sb_ref[...]                         # [w_ctx | wh_dec | whp@w_dec | whp]  (H, 12H+2)
    w_rec = wb[:, H4:]                       # fused decoder recurrent RHS          (H, 8H+2)

    # ---- hoisted broadcast constants: one tanh push covers all 4 gates ----
    act_scale = jnp.concatenate(
        [jnp.full((1, 3 * H), 0.5, f32), jnp.ones((1, H), f32)], axis=-1)
    act_shift = jnp.concatenate(
        [jnp.full((1, 3 * H), 0.5, f32), jnp.zeros((1, H), f32)], axis=-1)
    act_scale_b = jnp.broadcast_to(act_scale, (batch, H4))
    act_shift_b = jnp.broadcast_to(act_shift, (batch, H4))
    bhp_b = jnp.broadcast_to(bhp, (batch, 2))
    bhp_wdec_b = jnp.broadcast_to(bhp_wdec, (batch, H4))

    def lstm_step(gates, c):
        # sigmoid(x) = 0.5*tanh(0.5*x) + 0.5  ->  ONE EUP tanh for i, f, o AND g.
        u = jnp.tanh(gates * act_scale_b)
        a = u * act_scale_b + act_shift_b
        i = a[:, :H]
        f = a[:, H:2 * H]
        o = a[:, 2 * H:3 * H]
        g = a[:, 3 * H:]
        c_new = f * c + i * g
        h_new = o * jnp.tanh(c_new)
        return h_new, c_new

    obs = obs_ref[...]                       # (obs_len, B, 2)
    # obs_traj_nm = obs_traj - obs_traj[:, :, 0].unsqueeze(2)  (literal PyTorch indexing)
    obs_nm = obs - obs[:, :, 0:1]
    last_pos = obs_nm[obs_len - 1]           # (B, 2)

    # ------------------------------- encoder -------------------------------
    # Whole input path as ONE off-recurrence MXU matmul over all timesteps.
    x_flat = obs_nm.reshape(obs_len * batch, 2)
    x_pre = jnp.dot(x_flat, w_enc, preferred_element_type=f32) + b_enc  # (obs_len*B, 4H)

    # t = 0: h0 = c0 = 0, so the h @ W_hh matmul is skipped entirely.
    h, c = lstm_step(x_pre[0:batch, :], jnp.zeros((batch, H), f32))
    for t in range(1, obs_len):              # small trip count -> unrolled
        gates = x_pre[t * batch:(t + 1) * batch, :] + jnp.dot(
            h, wh_enc, preferred_element_type=f32)
        h, c = lstm_step(gates, c)
    context = h                              # (B, H) == final_h

    # ------------------------------- decoder -------------------------------
    # One matmul gives context@w_ctx (constant input part) and context@wh_dec (step-1 h path).
    pre = jnp.dot(context, wb[:, :2 * H4], preferred_element_type=f32)  # (B, 8H)
    # a_in carries the full input-side gate contribution for the current step:
    #   a_in_t = last_pos_{t-1} @ w_dec + context @ w_ctx + b_dec
    a_in = jnp.dot(last_pos, w_dec, preferred_element_type=f32) + pre[:, :H4] + b_dec
    m_h = pre[:, H4:]                        # hd_{t-1} @ wh_dec for step 1

    hd = context
    cd = context
    abs_steps = []
    rel_steps = []
    for _ in range(pred_len):
        gates = a_in + m_h
        hd, cd = lstm_step(gates, cd)
        # Fused recurrent matmul: [hd@wh_dec | hd@(whp@w_dec) | hd@whp] in one MXU push.
        m = jnp.dot(hd, w_rec, preferred_element_type=f32)              # (B, 8H+2)
        m_h = m[:, :H4]                                                 # next-step h path
        pos_rel = m[:, 2 * H4:] + bhp_b                                 # hidden2pos head
        last_pos = last_pos + pos_rel                                   # relative_to_abs, seq=1
        a_in = a_in + m[:, H4:2 * H4] + bhp_wdec_b                      # next-step input path
        abs_steps.append(last_pos)
        rel_steps.append(pos_rel)

    # Single store per output (avoids 2*pred_len masked lane-2 stores).
    abs_ref[...] = jnp.stack(abs_steps, axis=0)
    rel_ref[...] = jnp.stack(rel_steps, axis=0)


# ---------------------------------------------------------------------------
# Wrapper: fuse/fold/pack params (outside the kernel) and call pallas_call
# ---------------------------------------------------------------------------
def _pack_params(params):
    """Fuse per-gate LSTM weights into (in, 4H) slabs in (i, f, o, g) order, fold the
    purely-linear spatial embedding through the LSTM input weights, fold the hidden2pos
    head into the decoder recurrence, and pack everything into two contiguous slabs."""
    emb = params["wse"].shape[1]
    H = params["whe"].shape[-1]

    def fuse(w4):  # (4, in, H) in (i, f, g, o) order -> (in, 4H) in (i, f, o, g)
        return jnp.concatenate([w4[0], w4[1], w4[3], w4[2]], axis=-1)

    wie = fuse(params["wie"])
    whe = fuse(params["whe"])
    be = fuse(params["be"])
    wid = fuse(params["wid"])
    whd = fuse(params["whd"])
    bd = fuse(params["bd"])
    wid_emb, wid_ctx = wid[:emb], wid[emb:]

    w_enc = params["wse"] @ wie                 # (2, 4H)
    b_enc = params["bse"] @ wie + be            # (1, 4H)
    w_dec = params["wse"] @ wid_emb             # (2, 4H)
    b_dec = params["bse"] @ wid_emb + bd        # (1, 4H)
    whp = params["whp"]                         # (H, 2)
    bhp = params["bhp"]                         # (1, 2)
    whp_wdec = whp @ w_dec                      # (H, 4H) hidden2pos folded into recurrence
    bhp_wdec = bhp @ w_dec                      # (1, 4H)
    bhp_pad = jnp.zeros((1, 4 * H), jnp.float32).at[:, :2].set(bhp)

    # slab A: 8-row header (one sublane tile) + encoder W_hh  -> (8 + H, 4H)
    slab_a = jnp.concatenate(
        [w_enc, b_enc, bhp_pad, bhp_wdec, b_dec, w_dec, whe], axis=0).astype(jnp.float32)
    # slab B: [w_ctx | wh_dec | whp@w_dec | whp]  -> (H, 12H + 2)
    slab_b = jnp.concatenate(
        [wid_ctx, whd, whp_wdec, whp], axis=-1).astype(jnp.float32)
    return slab_a, slab_b


def trajectory_predictor(obs_traj, params, *, pred_len, batch_tile=None):
    """obs_traj: (obs_len, batch, 2) f32. Returns ((pred_abs, pred_rel), loss)."""
    obs_len, batch, _ = obs_traj.shape
    hdim = params["whe"].shape[-1]
    obs_traj = obs_traj.astype(jnp.float32)
    slab_a, slab_b = _pack_params(params)

    # Batch-tile grid axis ("parallel"): splits independent trajectories across v7x's two
    # TensorCores for large batches; degenerates to a single grid point at small batch.
    if batch_tile is None:
        batch_tile = 128 if (batch > 128 and batch % 128 == 0) else batch
    assert batch % batch_tile == 0, "batch must be divisible by batch_tile"
    grid = (batch // batch_tile,)

    kernel = functools.partial(_traj_kernel, obs_len=obs_len, pred_len=pred_len,
                               batch=batch_tile, hdim=hdim)
    traj_spec = lambda n: pl.BlockSpec((n, batch_tile, 2), lambda i: (0, i, 0))
    out_shape = (jax.ShapeDtypeStruct((pred_len, batch, 2), jnp.float32),
                 jax.ShapeDtypeStruct((pred_len, batch, 2), jnp.float32))

    pred_abs, pred_rel = pl.pallas_call(
        kernel,
        out_shape=out_shape,
        grid_spec=pltpu.PrefetchScalarGridSpec(
            num_scalar_prefetch=0,
            grid=grid,
            in_specs=[
                traj_spec(obs_len),
                pl.BlockSpec(slab_a.shape, lambda i: (0, 0)),   # constant block index ->
                pl.BlockSpec(slab_b.shape, lambda i: (0, 0)),   # weights loaded once
            ],
            out_specs=[traj_spec(pred_len), traj_spec(pred_len)],
        ),
        compiler_params=pltpu.CompilerParams(
            dimension_semantics=("parallel",)),
    )(obs_traj, slab_a, slab_b)
    # TODO(synk): the PyTorch forward's loss / pred_traj tail references the undefined
    # name `pred_traj_nm` (NameError); we return the well-defined decoder outputs, loss=None.
    return (pred_abs, pred_rel), None


# ---------------------------------------------------------------------------
# Deterministic parameter init (shapes follow the nn.Module __init__)
# ---------------------------------------------------------------------------
def init_params(key, emb=64, hdim=64):
    ks = jax.random.split(key, 10)

    def n(k, shape, std=0.1):
        return (std * jax.random.normal(k, shape, jnp.float32)).astype(jnp.float32)

    return dict(
        wse=n(ks[0], (2, emb)),              # spatial_embedding Linear(2, emb) (transposed)
        bse=n(ks[1], (1, emb)),
        wie=n(ks[2], (4, emb, hdim)),        # encoder LSTM weight_ih^T split (i,f,g,o)
        whe=n(ks[3], (4, hdim, hdim)),       # encoder LSTM weight_hh^T split
        be=n(ks[4], (4, 1, hdim)),           # encoder bias_ih + bias_hh
        wid=n(ks[5], (4, emb + hdim, hdim)), # decoder LSTM weight_ih^T split
        whd=n(ks[6], (4, hdim, hdim)),       # decoder LSTM weight_hh^T split
        bd=n(ks[7], (4, 1, hdim)),           # decoder bias_ih + bias_hh
        whp=n(ks[8], (hdim, 2)),             # hidden2pos Linear(hdim, 2) (transposed)
        bhp=n(ks[9], (1, 2)),
    )


# ---------------------------------------------------------------------------
# Pure-JAX reference (original unfused math, i/f/g/o order) for correctness
# ---------------------------------------------------------------------------
def _reference(obs_traj, params, *, pred_len):
    obs_len, batch, _ = obs_traj.shape
    hdim = params["whe"].shape[-1]
    obs_nm = obs_traj - obs_traj[:, :, 0:1]
    last_pos = obs_nm[-1]

    def cell(x, h, c, wi, wh, b):
        i = jax.nn.sigmoid(x @ wi[0] + h @ wh[0] + b[0])
        f = jax.nn.sigmoid(x @ wi[1] + h @ wh[1] + b[1])
        g = jnp.tanh(x @ wi[2] + h @ wh[2] + b[2])
        o = jax.nn.sigmoid(x @ wi[3] + h @ wh[3] + b[3])
        c = f * c + i * g
        return o * jnp.tanh(c), c

    h = jnp.zeros((batch, hdim)); c = jnp.zeros((batch, hdim))
    for t in range(obs_len):
        x = obs_nm[t] @ params["wse"] + params["bse"]
        h, c = cell(x, h, c, params["wie"], params["whe"], params["be"])
    context = h
    hd, cd = context, context
    abs_out, rel_out = [], []
    for _ in range(pred_len):
        emb_x = last_pos @ params["wse"] + params["bse"]
        x = jnp.concatenate([emb_x, context], axis=1)
        hd, cd = cell(x, hd, cd, params["wid"], params["whd"], params["bd"])
        pos_rel = hd @ params["whp"] + params["bhp"]
        last_pos = last_pos + pos_rel
        abs_out.append(last_pos); rel_out.append(pos_rel)
    return jnp.stack(abs_out, 0), jnp.stack(rel_out, 0)


if __name__ == "__main__":
    obs_len, pred_len, batch, emb, hdim = 8, 8, 8, 64, 64

    key = jax.random.PRNGKey(0)
    kp, kx = jax.random.split(key)
    params = init_params(kp, emb=emb, hdim=hdim)
    obs_traj = jax.random.normal(kx, (obs_len, batch, 2), jnp.float32)

    fwd = jax.jit(functools.partial(trajectory_predictor, pred_len=pred_len))
    (pred_abs, pred_rel), loss = fwd(obs_traj, params)
    jax.block_until_ready((pred_abs, pred_rel))

    ref_abs, ref_rel = _reference(obs_traj, params, pred_len=pred_len)
    assert pred_abs.shape == (pred_len, batch, 2)
    assert pred_rel.shape == (pred_len, batch, 2)
    # 5e-4 tolerance: the fused kernel reassociates the folded hidden2pos / input path and
    # lowers sigmoid via tanh; differences vs the unfused f32 reference remain tiny.
    assert jnp.allclose(pred_abs, ref_abs, atol=5e-4, rtol=5e-4)
    assert jnp.allclose(pred_rel, ref_rel, atol=5e-4, rtol=5e-4)
    assert loss is None

    print("KERNEL_OK")
</pallas_src>

<mosaic_0001>
module attributes {stable_mosaic.version = 11 : i64} {
  func.func @_traj_kernel(%arg0: i32, %arg1: memref<8x8x2xf32, #tpu.memory_space<vmem>>, %arg2: memref<72x256xf32, #tpu.memory_space<vmem>>, %arg3: memref<64x770xf32, #tpu.memory_space<vmem>>, %arg4: memref<8x8x2xf32, #tpu.memory_space<vmem>>, %arg5: memref<8x8x2xf32, #tpu.memory_space<vmem>>) attributes {dimension_semantics = [#tpu.dimension_semantics<parallel>], iteration_bounds = array<i64: 1>, scalar_prefetch = 0 : i64, scratch_operands = 0 : i64, tpu.core_type = #tpu.core_type<tc>, window_params = [{transform_indices = @transform_0, window_bounds = array<i64: 8, 8, 2>}, {pipeline_mode = #tpu.pipeline_mode<synchronous>, transform_indices = @transform_1, window_bounds = array<i64: 72, 256>}, {pipeline_mode = #tpu.pipeline_mode<synchronous>, transform_indices = @transform_2, window_bounds = array<i64: 64, 770>}, {transform_indices = @transform_3, window_bounds = array<i64: 8, 8, 2>}, {transform_indices = @transform_4, window_bounds = array<i64: 8, 8, 2>}]} {
    %c0 = arith.constant 0 : index
    %c0_0 = arith.constant 0 : index
    %0 = vector.load %arg2[%c0, %c0_0] : memref<72x256xf32, #tpu.memory_space<vmem>>, vector<8x256xf32>
    %1 = vector.extract_strided_slice %0 {offsets = [0, 0], sizes = [2, 256], strides = [1, 1]} : vector<8x256xf32> to vector<2x256xf32>
    %2 = vector.extract_strided_slice %0 {offsets = [2, 0], sizes = [1, 256], strides = [1, 1]} : vector<8x256xf32> to vector<1x256xf32>
    %3 = vector.extract_strided_slice %0 {offsets = [3, 0], sizes = [1, 2], strides = [1, 1]} : vector<8x256xf32> to vector<1x2xf32>
    %4 = vector.extract_strided_slice %0 {offsets = [4, 0], sizes = [1, 256], strides = [1, 1]} : vector<8x256xf32> to vector<1x256xf32>
    %5 = vector.extract_strided_slice %0 {offsets = [5, 0], sizes = [1, 256], strides = [1, 1]} : vector<8x256xf32> to vector<1x256xf32>
    %6 = vector.extract_strided_slice %0 {offsets = [6, 0], sizes = [2, 256], strides = [1, 1]} : vector<8x256xf32> to vector<2x256xf32>
    %c8 = arith.constant 8 : index
    %c0_1 = arith.constant 0 : index
    %7 = vector.load %arg2[%c8, %c0_1] : memref<72x256xf32, #tpu.memory_space<vmem>>, vector<64x256xf32>
    %c0_2 = arith.constant 0 : index
    %c0_3 = arith.constant 0 : index
    %8 = vector.load %arg3[%c0_2, %c0_3] : memref<64x770xf32, #tpu.memory_space<vmem>>, vector<64x770xf32>
    %9 = vector.extract_strided_slice %8 {offsets = [0, 256], sizes = [64, 514], strides = [1, 1]} : vector<64x770xf32> to vector<64x514xf32>
    %cst = arith.constant 5.000000e-01 : f32
    %10 = vector.broadcast %cst : f32 to vector<1x192xf32>
    %cst_4 = arith.constant 1.000000e+00 : f32
    %11 = vector.broadcast %cst_4 : f32 to vector<1x64xf32>
    %12 = tpu.concatenate %10, %11 in 1 : vector<1x192xf32>, vector<1x64xf32> -> vector<1x256xf32>
    %cst_5 = arith.constant 5.000000e-01 : f32
    %13 = vector.broadcast %cst_5 : f32 to vector<1x192xf32>
    %cst_6 = arith.constant 0.000000e+00 : f32
    %14 = vector.broadcast %cst_6 : f32 to vector<1x64xf32>
    %15 = tpu.concatenate %13, %14 in 1 : vector<1x192xf32>, vector<1x64xf32> -> vector<1x256xf32>
    %16 = vector.shape_cast %12 : vector<1x256xf32> to vector<1x256xf32>
    %17 = vector.broadcast %16 : vector<1x256xf32> to vector<8x256xf32>
    %18 = vector.shape_cast %15 : vector<1x256xf32> to vector<1x256xf32>
    %19 = vector.broadcast %18 : vector<1x256xf32> to vector<8x256xf32>
    %20 = vector.shape_cast %3 : vector<1x2xf32> to vector<1x2xf32>
    %21 = vector.broadcast %20 : vector<1x2xf32> to vector<8x2xf32>
    %22 = vector.shape_cast %4 : vector<1x256xf32> to vector<1x256xf32>
    %23 = vector.broadcast %22 : vector<1x256xf32> to vector<8x256xf32>
    %c0_7 = arith.constant 0 : index
    %c0_8 = arith.constant 0 : index
    %c0_9 = arith.constant 0 : index
    %24 = vector.load %arg1[%c0_7, %c0_8, %c0_9] : memref<8x8x2xf32, #tpu.memory_space<vmem>>, vector<8x8x2xf32>
    %25 = vector.extract_strided_slice %24 {offsets = [0, 0, 0], sizes = [8, 8, 1], strides = [1, 1, 1]} : vector<8x8x2xf32> to vector<8x8x1xf32>
    %26 = vector.broadcast %25 : vector<8x8x1xf32> to vector<8x8x2xf32>
    %27 = arith.subf %24, %26 : vector<8x8x2xf32>
    %28 = vector.extract_strided_slice %27 {offsets = [7, 0, 0], sizes = [1, 8, 2], strides = [1, 1, 1]} : vector<8x8x2xf32> to vector<1x8x2xf32>
    %29 = vector.shape_cast %28 : vector<1x8x2xf32> to vector<8x2xf32>
    %30 = vector.shape_cast %27 : vector<8x8x2xf32> to vector<64x2xf32>
    %cst_10 = arith.constant dense<0.000000e+00> : vector<64x256xf32>
    %31 = tpu.matmul %30, %1, %cst_10 {dimension_numbers = #tpu.dot_dimension_numbers<[1], [0], [0], [1], [0, 0, 1, 1], [], []>} : vector<64x2xf32>, vector<2x256xf32>, vector<64x256xf32> -> vector<64x256xf32>
    %32 = vector.broadcast %2 : vector<1x256xf32> to vector<64x256xf32>
    %33 = arith.addf %31, %32 : vector<64x256xf32>
    %34 = vector.extract_strided_slice %33 {offsets = [0, 0], sizes = [8, 256], strides = [1, 1]} : vector<64x256xf32> to vector<8x256xf32>
    %cst_11 = arith.constant 0.000000e+00 : f32
    %35 = vector.broadcast %cst_11 : f32 to vector<8x64xf32>
    %36 = arith.mulf %34, %17 : vector<8x256xf32>
    %37 = math.tanh %36 : vector<8x256xf32>
    %38 = arith.mulf %37, %17 : vector<8x256xf32>
    %39 = arith.addf %38, %19 : vector<8x256xf32>
    %40 = vector.extract_strided_slice %39 {offsets = [0, 0], sizes = [8, 64], strides = [1, 1]} : vector<8x256xf32> to vector<8x64xf32>
    %41 = vector.extract_strided_slice %39 {offsets = [0, 64], sizes = [8, 64], strides = [1, 1]} : vector<8x256xf32> to vector<8x64xf32>
    %42 = vector.extract_strided_slice %39 {offsets = [0, 128], sizes = [8, 64], strides = [1, 1]} : vector<8x256xf32> to vector<8x64xf32>
    %43 = vector.extract_strided_slice %39 {offsets = [0, 192], sizes = [8, 64], strides = [1, 1]} : vector<8x256xf32> to vector<8x64xf32>
    %44 = arith.mulf %41, %35 : vector<8x64xf32>
    %45 = arith.mulf %40, %43 : vector<8x64xf32>
    %46 = arith.addf %44, %45 : vector<8x64xf32>
    %47 = math.tanh %46 : vector<8x64xf32>
    %48 = arith.mulf %42, %47 : vector<8x64xf32>
    %49 = vector.extract_strided_slice %33 {offsets = [8, 0], sizes = [8, 256], strides = [1, 1]} : vector<64x256xf32> to vector<8x256xf32>
    %cst_12 = arith.constant dense<0.000000e+00> : vector<8x256xf32>
    %50 = tpu.matmul %48, %7, %cst_12 {dimension_numbers = #tpu.dot_dimension_numbers<[1], [0], [0], [1], [0, 0, 1, 1], [], []>} : vector<8x64xf32>, vector<64x256xf32>, vector<8x256xf32> -> vector<8x256xf32>
    %51 = arith.addf %49, %50 : vector<8x256xf32>
    %52 = arith.mulf %51, %17 : vector<8x256xf32>
    %53 = math.tanh %52 : vector<8x256xf32>
    %54 = arith.mulf %53, %17 : vector<8x256xf32>
    %55 = arith.addf %54, %19 : vector<8x256xf32>
    %56 = vector.extract_strided_slice %55 {offsets = [0, 0], sizes = [8, 64], strides = [1, 1]} : vector<8x256xf32> to vector<8x64xf32>
    %57 = vector.extract_strided_slice %55 {offsets = [0, 64], sizes = [8, 64], strides = [1, 1]} : vector<8x256xf32> to vector<8x64xf32>
    %58 = vector.extract_strided_slice %55 {offsets = [0, 128], sizes = [8, 64], strides = [1, 1]} : vector<8x256xf32> to vector<8x64xf32>
    %59 = vector.extract_strided_slice %55 {offsets = [0, 192], sizes = [8, 64], strides = [1, 1]} : vector<8x256xf32> to vector<8x64xf32>
    %60 = arith.mulf %57, %46 : vector<8x64xf32>
    %61 = arith.mulf %56, %59 : vector<8x64xf32>
    %62 = arith.addf %60, %61 : vector<8x64xf32>
    %63 = math.tanh %62 : vector<8x64xf32>
    %64 = arith.mulf %58, %63 : vector<8x64xf32>
    %65 = vector.extract_strided_slice %33 {offsets = [16, 0], sizes = [8, 256], strides = [1, 1]} : vector<64x256xf32> to vector<8x256xf32>
    %cst_13 = arith.constant dense<0.000000e+00> : vector<8x256xf32>
    %66 = tpu.matmul %64, %7, %cst_13 {dimension_numbers = #tpu.dot_dimension_numbers<[1], [0], [0], [1], [0, 0, 1, 1], [], []>} : vector<8x64xf32>, vector<64x256xf32>, vector<8x256xf32> -> vector<8x256xf32>
    %67 = arith.addf %65, %66 : vector<8x256xf32>
    %68 = arith.mulf %67, %17 : vector<8x256xf32>
    %69 = math.tanh %68 : vector<8x256xf32>
    %70 = arith.mulf %69, %17 : vector<8x256xf32>
    %71 = arith.addf %70, %19 : vector<8x256xf32>
    %72 = vector.extract_strided_slice %71 {offsets = [0, 0], sizes = [8, 64], strides = [1, 1]} : vector<8x256xf32> to vector<8x64xf32>
    %73 = vector.extract_strided_slice %71 {offsets = [0, 64], sizes = [8, 64], strides = [1, 1]} : vector<8x256xf32> to vector<8x64xf32>
    %74 = vector.extract_strided_slice %71 {offsets = [0, 128], sizes = [8, 64], strides = [1, 1]} : vector<8x256xf32> to vector<8x64xf32>
    %75 = vector.extract_strided_slice %71 {offsets = [0, 192], sizes = [8, 64], strides = [1, 1]} : vector<8x256xf32> to vector<8x64xf32>
    %76 = arith.mulf %73, %62 : vector<8x64xf32>
    %77 = arith.mulf %72, %75 : vector<8x64xf32>
    %78 = arith.addf %76, %77 : vector<8x64xf32>
    %79 = math.tanh %78 : vector<8x64xf32>
    %80 = arith.mulf %74, %79 : vector<8x64xf32>
    %81 = vector.extract_strided_slice %33 {offsets = [24, 0], sizes = [8, 256], strides = [1, 1]} : vector<64x256xf32> to vector<8x256xf32>
    %cst_14 = arith.constant dense<0.000000e+00> : vector<8x256xf32>
    %82 = tpu.matmul %80, %7, %cst_14 {dimension_numbers = #tpu.dot_dimension_numbers<[1], [0], [0], [1], [0, 0, 1, 1], [], []>} : vector<8x64xf32>, vector<64x256xf32>, vector<8x256xf32> -> vector<8x256xf32>
    %83 = arith.addf %81, %82 : vector<8x256xf32>
    %84 = arith.mulf %83, %17 : vector<8x256xf32>
    %85 = math.tanh %84 : vector<8x256xf32>
    %86 = arith.mulf %85, %17 : vector<8x256xf32>
    %87 = arith.addf %86, %19 : vector<8x256xf32>
    %88 = vector.extract_strided_slice %87 {offsets = [0, 0], sizes = [8, 64], strides = [1, 1]} : vector<8x256xf32> to vector<8x64xf32>
    %89 = vector.extract_strided_slice %87 {offsets = [0, 64], sizes = [8, 64], strides = [1, 1]} : vector<8x256xf32> to vector<8x64xf32>
    %90 = vector.extract_strided_slice %87 {offsets = [0, 128], sizes = [8, 64], strides = [1, 1]} : vector<8x256xf32> to vector<8x64xf32>
    %91 = vector.extract_strided_slice %87 {offsets = [0, 192], sizes = [8, 64], strides = [1, 1]} : vector<8x256xf32> to vector<8x64xf32>
    %92 = arith.mulf %89, %78 : vector<8x64xf32>
    %93 = arith.mulf %88, %91 : vector<8x64xf32>
    %94 = arith.addf %92, %93 : vector<8x64xf32>
    %95 = math.tanh %94 : vector<8x64xf32>
    %96 = arith.mulf %90, %95 : vector<8x64xf32>
    %97 = vector.extract_strided_slice %33 {offsets = [32, 0], sizes = [8, 256], strides = [1, 1]} : vector<64x256xf32> to vector<8x256xf32>
    %cst_15 = arith.constant dense<0.000000e+00> : vector<8x256xf32>
    %98 = tpu.matmul %96, %7, %cst_15 {dimension_numbers = #tpu.dot_dimension_numbers<[1], [0], [0], [1], [0, 0, 1, 1], [], []>} : vector<8x64xf32>, vector<64x256xf32>, vector<8x256xf32> -> vector<8x256xf32>
    %99 = arith.addf %97, %98 : vector<8x256xf32>
    %100 = arith.mulf %99, %17 : vector<8x256xf32>
    %101 = math.tanh %100 : vector<8x256xf32>
    %102 = arith.mulf %101, %17 : vector<8x256xf32>
    %103 = arith.addf %102, %19 : vector<8x256xf32>
    %104 = vector.extract_strided_slice %103 {offsets = [0, 0], sizes = [8, 64], strides = [1, 1]} : vector<8x256xf32> to vector<8x64xf32>
    %105 = vector.extract_strided_slice %103 {offsets = [0, 64], sizes = [8, 64], strides = [1, 1]} : vector<8x256xf32> to vector<8x64xf32>
    %106 = vector.extract_strided_slice %103 {offsets = [0, 128], sizes = [8, 64], strides = [1, 1]} : vector<8x256xf32> to vector<8x64xf32>
    %107 = vector.extract_strided_slice %103 {offsets = [0, 192], sizes = [8, 64], strides = [1, 1]} : vector<8x256xf32> to vector<8x64xf32>
    %108 = arith.mulf %105, %94 : vector<8x64xf32>
    %109 = arith.mulf %104, %107 : vector<8x64xf32>
    %110 = arith.addf %108, %109 : vector<8x64xf32>
    %111 = math.tanh %110 : vector<8x64xf32>
    %112 = arith.mulf %106, %111 : vector<8x64xf32>
    %113 = vector.extract_strided_slice %33 {offsets = [40, 0], sizes = [8, 256], strides = [1, 1]} : vector<64x256xf32> to vector<8x256xf32>
    %cst_16 = arith.constant dense<0.000000e+00> : vector<8x256xf32>
    %114 = tpu.matmul %112, %7, %cst_16 {dimension_numbers = #tpu.dot_dimension_numbers<[1], [0], [0], [1], [0, 0, 1, 1], [], []>} : vector<8x64xf32>, vector<64x256xf32>, vector<8x256xf32> -> vector<8x256xf32>
    %115 = arith.addf %113, %114 : vector<8x256xf32>
    %116 = arith.mulf %115, %17 : vector<8x256xf32>
    %117 = math.tanh %116 : vector<8x256xf32>
    %118 = arith.mulf %117, %17 : vector<8x256xf32>
    %119 = arith.addf %118, %19 : vector<8x256xf32>
    %120 = vector.extract_strided_slice %119 {offsets = [0, 0], sizes = [8, 64], strides = [1, 1]} : vector<8x256xf32> to vector<8x64xf32>
    %121 = vector.extract_strided_slice %119 {offsets = [0, 64], sizes = [8, 64], strides = [1, 1]} : vector<8x256xf32> to vector<8x64xf32>
    %122 = vector.extract_strided_slice %119 {offsets = [0, 128], sizes = [8, 64], strides = [1, 1]} : vector<8x256xf32> to vector<8x64xf32>
    %123 = vector.extract_strided_slice %119 {offsets = [0, 192], sizes = [8, 64], strides = [1, 1]} : vector<8x256xf32> to vector<8x64xf32>
    %124 = arith.mulf %121, %110 : vector<8x64xf32>
    %125 = arith.mulf %120, %123 : vector<8x64xf32>
    %126 = arith.addf %124, %125 : vector<8x64xf32>
    %127 = math.tanh %126 : vector<8x64xf32>
    %128 = arith.mulf %122, %127 : vector<8x64xf32>
    %129 = vector.extract_strided_slice %33 {offsets = [48, 0], sizes = [8, 256], strides = [1, 1]} : vector<64x256xf32> to vector<8x256xf32>
    %cst_17 = arith.constant dense<0.000000e+00> : vector<8x256xf32>
    %130 = tpu.matmul %128, %7, %cst_17 {dimension_numbers = #tpu.dot_dimension_numbers<[1], [0], [0], [1], [0, 0, 1, 1], [], []>} : vector<8x64xf32>, vector<64x256xf32>, vector<8x256xf32> -> vector<8x256xf32>
    %131 = arith.addf %129, %130 : vector<8x256xf32>
    %132 = arith.mulf %131, %17 : vector<8x256xf32>
    %133 = math.tanh %132 : vector<8x256xf32>
    %134 = arith.mulf %133, %17 : vector<8x256xf32>
    %135 = arith.addf %134, %19 : vector<8x256xf32>
    %136 = vector.extract_strided_slice %135 {offsets = [0, 0], sizes = [8, 64], strides = [1, 1]} : vector<8x256xf32> to vector<8x64xf32>
    %137 = vector.extract_strided_slice %135 {offsets = [0, 64], sizes = [8, 64], strides = [1, 1]} : vector<8x256xf32> to vector<8x64xf32>
    %138 = vector.extract_strided_slice %135 {offsets = [0, 128], sizes = [8, 64], strides = [1, 1]} : vector<8x256xf32> to vector<8x64xf32>
    %139 = vector.extract_strided_slice %135 {offsets = [0, 192], sizes = [8, 64], strides = [1, 1]} : vector<8x256xf32> to vector<8x64xf32>
    %140 = arith.mulf %137, %126 : vector<8x64xf32>
    %141 = arith.mulf %136, %139 : vector<8x64xf32>
    %142 = arith.addf %140, %141 : vector<8x64xf32>
    %143 = math.tanh %142 : vector<8x64xf32>
    %144 = arith.mulf %138, %143 : vector<8x64xf32>
    %145 = vector.extract_strided_slice %33 {offsets = [56, 0], sizes = [8, 256], strides = [1, 1]} : vector<64x256xf32> to vector<8x256xf32>
    %cst_18 = arith.constant dense<0.000000e+00> : vector<8x256xf32>
    %146 = tpu.matmul %144, %7, %cst_18 {dimension_numbers = #tpu.dot_dimension_numbers<[1], [0], [0], [1], [0, 0, 1, 1], [], []>} : vector<8x64xf32>, vector<64x256xf32>, vector<8x256xf32> -> vector<8x256xf32>
    %147 = arith.addf %145, %146 : vector<8x256xf32>
    %148 = arith.mulf %147, %17 : vector<8x256xf32>
    %149 = math.tanh %148 : vector<8x256xf32>
    %150 = arith.mulf %149, %17 : vector<8x256xf32>
    %151 = arith.addf %150, %19 : vector<8x256xf32>
    %152 = vector.extract_strided_slice %151 {offsets = [0, 0], sizes = [8, 64], strides = [1, 1]} : vector<8x256xf32> to vector<8x64xf32>
    %153 = vector.extract_strided_slice %151 {offsets = [0, 64], sizes = [8, 64], strides = [1, 1]} : vector<8x256xf32> to vector<8x64xf32>
    %154 = vector.extract_strided_slice %151 {offsets = [0, 128], sizes = [8, 64], strides = [1, 1]} : vector<8x256xf32> to vector<8x64xf32>
    %155 = vector.extract_strided_slice %151 {offsets = [0, 192], sizes = [8, 64], strides = [1, 1]} : vector<8x256xf32> to vector<8x64xf32>
    %156 = arith.mulf %153, %142 : vector<8x64xf32>
    %157 = arith.mulf %152, %155 : vector<8x64xf32>
    %158 = arith.addf %156, %157 : vector<8x64xf32>
    %159 = math.tanh %158 : vector<8x64xf32>
    %160 = arith.mulf %154, %159 : vector<8x64xf32>
    %161 = vector.extract_strided_slice %8 {offsets = [0, 0], sizes = [64, 512], strides = [1, 1]} : vector<64x770xf32> to vector<64x512xf32>
    %cst_19 = arith.constant dense<0.000000e+00> : vector<8x512xf32>
    %162 = tpu.matmul %160, %161, %cst_19 {dimension_numbers = #tpu.dot_dimension_numbers<[1], [0], [0], [1], [0, 0, 1, 1], [], []>} : vector<8x64xf32>, vector<64x512xf32>, vector<8x512xf32> -> vector<8x512xf32>
    %cst_20 = arith.constant dense<0.000000e+00> : vector<8x256xf32>
    %163 = tpu.matmul %29, %6, %cst_20 {dimension_numbers = #tpu.dot_dimension_numbers<[1], [0], [0], [1], [0, 0, 1, 1], [], []>} : vector<8x2xf32>, vector<2x256xf32>, vector<8x256xf32> -> vector<8x256xf32>
    %164 = vector.extract_strided_slice %162 {offsets = [0, 0], sizes = [8, 256], strides = [1, 1]} : vector<8x512xf32> to vector<8x256xf32>
    %165 = arith.addf %163, %164 : vector<8x256xf32>
    %166 = vector.broadcast %5 : vector<1x256xf32> to vector<8x256xf32>
    %167 = arith.addf %165, %166 : vector<8x256xf32>
    %168 = vector.extract_strided_slice %162 {offsets = [0, 256], sizes = [8, 256], strides = [1, 1]} : vector<8x512xf32> to vector<8x256xf32>
    %169 = arith.addf %167, %168 : vector<8x256xf32>
    %170 = arith.mulf %169, %17 : vector<8x256xf32>
    %171 = math.tanh %170 : vector<8x256xf32>
    %172 = arith.mulf %171, %17 : vector<8x256xf32>
    %173 = arith.addf %172, %19 : vector<8x256xf32>
    %174 = vector.extract_strided_slice %173 {offsets = [0, 0], sizes = [8, 64], strides = [1, 1]} : vector<8x256xf32> to vector<8x64xf32>
    %175 = vector.extract_strided_slice %173 {offsets = [0, 64], sizes = [8, 64], strides = [1, 1]} : vector<8x256xf32> to vector<8x64xf32>
    %176 = vector.extract_strided_slice %173 {offsets = [0, 128], sizes = [8, 64], strides = [1, 1]} : vector<8x256xf32> to vector<8x64xf32>
    %177 = vector.extract_strided_slice %173 {offsets = [0, 192], sizes = [8, 64], strides = [1, 1]} : vector<8x256xf32> to vector<8x64xf32>
    %178 = arith.mulf %175, %160 : vector<8x64xf32>
    %179 = arith.mulf %174, %177 : vector<8x64xf32>
    %180 = arith.addf %178, %179 : vector<8x64xf32>
    %181 = math.tanh %180 : vector<8x64xf32>
    %182 = arith.mulf %176, %181 : vector<8x64xf32>
    %cst_21 = arith.constant dense<0.000000e+00> : vector<8x514xf32>
    %183 = tpu.matmul %182, %9, %cst_21 {dimension_numbers = #tpu.dot_dimension_numbers<[1], [0], [0], [1], [0, 0, 1, 1], [], []>} : vector<8x64xf32>, vector<64x514xf32>, vector<8x514xf32> -> vector<8x514xf32>
    %184 = vector.extract_strided_slice %183 {offsets = [0, 0], sizes = [8, 256], strides = [1, 1]} : vector<8x514xf32> to vector<8x256xf32>
    %185 = vector.extract_strided_slice %183 {offsets = [0, 512], sizes = [8, 2], strides = [1, 1]} : vector<8x514xf32> to vector<8x2xf32>
    %186 = arith.addf %185, %21 : vector<8x2xf32>
    %187 = arith.addf %29, %186 : vector<8x2xf32>
    %188 = vector.extract_strided_slice %183 {offsets = [0, 256], sizes = [8, 256], strides = [1, 1]} : vector<8x514xf32> to vector<8x256xf32>
    %189 = arith.addf %167, %188 : vector<8x256xf32>
    %190 = arith.addf %189, %23 : vector<8x256xf32>
    %191 = arith.addf %190, %184 : vector<8x256xf32>
    %192 = arith.mulf %191, %17 : vector<8x256xf32>
    %193 = math.tanh %192 : vector<8x256xf32>
    %194 = arith.mulf %193, %17 : vector<8x256xf32>
    %195 = arith.addf %194, %19 : vector<8x256xf32>
    %196 = vector.extract_strided_slice %195 {offsets = [0, 0], sizes = [8, 64], strides = [1, 1]} : vector<8x256xf32> to vector<8x64xf32>
    %197 = vector.extract_strided_slice %195 {offsets = [0, 64], sizes = [8, 64], strides = [1, 1]} : vector<8x256xf32> to vector<8x64xf32>
    %198 = vector.extract_strided_slice %195 {offsets = [0, 128], sizes = [8, 64], strides = [1, 1]} : vector<8x256xf32> to vector<8x64xf32>
    %199 = vector.extract_strided_slice %195 {offsets = [0, 192], sizes = [8, 64], strides = [1, 1]} : vector<8x256xf32> to vector<8x64xf32>
    %200 = arith.mulf %197, %180 : vector<8x64xf32>
    %201 = arith.mulf %196, %199 : vector<8x64xf32>
    %202 = arith.addf %200, %201 : vector<8x64xf32>
    %203 = math.tanh %202 : vector<8x64xf32>
    %204 = arith.mulf %198, %203 : vector<8x64xf32>
    %cst_22 = arith.constant dense<0.000000e+00> : vector<8x514xf32>
    %205 = tpu.matmul %204, %9, %cst_22 {dimension_numbers = #tpu.dot_dimension_numbers<[1], [0], [0], [1], [0, 0, 1, 1], [], []>} : vector<8x64xf32>, vector<64x514xf32>, vector<8x514xf32> -> vector<8x514xf32>
    %206 = vector.extract_strided_slice %205 {offsets = [0, 0], sizes = [8, 256], strides = [1, 1]} : vector<8x514xf32> to vector<8x256xf32>
    %207 = vector.extract_strided_slice %205 {offsets = [0, 512], sizes = [8, 2], strides = [1, 1]} : vector<8x514xf32> to vector<8x2xf32>
    %208 = arith.addf %207, %21 : vector<8x2xf32>
    %209 = arith.addf %187, %208 : vector<8x2xf32>
    %210 = vector.extract_strided_slice %205 {offsets = [0, 256], sizes = [8, 256], strides = [1, 1]} : vector<8x514xf32> to vector<8x256xf32>
    %211 = arith.addf %190, %210 : vector<8x256xf32>
    %212 = arith.addf %211, %23 : vector<8x256xf32>
    %213 = arith.addf %212, %206 : vector<8x256xf32>
    %214 = arith.mulf %213, %17 : vector<8x256xf32>
    %215 = math.tanh %214 : vector<8x256xf32>
    %216 = arith.mulf %215, %17 : vector<8x256xf32>
    %217 = arith.addf %216, %19 : vector<8x256xf32>
    %218 = vector.extract_strided_slice %217 {offsets = [0, 0], sizes = [8, 64], strides = [1, 1]} : vector<8x256xf32> to vector<8x64xf32>
    %219 = vector.extract_strided_slice %217 {offsets = [0, 64], sizes = [8, 64], strides = [1, 1]} : vector<8x256xf32> to vector<8x64xf32>
    %220 = vector.extract_strided_slice %217 {offsets = [0, 128], sizes = [8, 64], strides = [1, 1]} : vector<8x256xf32> to vector<8x64xf32>
    %221 = vector.extract_strided_slice %217 {offsets = [0, 192], sizes = [8, 64], strides = [1, 1]} : vector<8x256xf32> to vector<8x64xf32>
    %222 = arith.mulf %219, %202 : vector<8x64xf32>
    %223 = arith.mulf %218, %221 : vector<8x64xf32>
    %224 = arith.addf %222, %223 : vector<8x64xf32>
    %225 = math.tanh %224 : vector<8x64xf32>
    %226 = arith.mulf %220, %225 : vector<8x64xf32>
    %cst_23 = arith.constant dense<0.000000e+00> : vector<8x514xf32>
    %227 = tpu.matmul %226, %9, %cst_23 {dimension_numbers = #tpu.dot_dimension_numbers<[1], [0], [0], [1], [0, 0, 1, 1], [], []>} : vector<8x64xf32>, vector<64x514xf32>, vector<8x514xf32> -> vector<8x514xf32>
    %228 = vector.extract_strided_slice %227 {offsets = [0, 0], sizes = [8, 256], strides = [1, 1]} : vector<8x514xf32> to vector<8x256xf32>
    %229 = vector.extract_strided_slice %227 {offsets = [0, 512], sizes = [8, 2], strides = [1, 1]} : vector<8x514xf32> to vector<8x2xf32>
    %230 = arith.addf %229, %21 : vector<8x2xf32>
    %231 = arith.addf %209, %230 : vector<8x2xf32>
    %232 = vector.extract_strided_slice %227 {offsets = [0, 256], sizes = [8, 256], strides = [1, 1]} : vector<8x514xf32> to vector<8x256xf32>
    %233 = arith.addf %212, %232 : vector<8x256xf32>
    %234 = arith.addf %233, %23 : vector<8x256xf32>
    %235 = arith.addf %234, %228 : vector<8x256xf32>
    %236 = arith.mulf %235, %17 : vector<8x256xf32>
    %237 = math.tanh %236 : vector<8x256xf32>
    %238 = arith.mulf %237, %17 : vector<8x256xf32>
    %239 = arith.addf %238, %19 : vector<8x256xf32>
    %240 = vector.extract_strided_slice %239 {offsets = [0, 0], sizes = [8, 64], strides = [1, 1]} : vector<8x256xf32> to vector<8x64xf32>
    %241 = vector.extract_strided_slice %239 {offsets = [0, 64], sizes = [8, 64], strides = [1, 1]} : vector<8x256xf32> to vector<8x64xf32>
    %242 = vector.extract_strided_slice %239 {offsets = [0, 128], sizes = [8, 64], strides = [1, 1]} : vector<8x256xf32> to vector<8x64xf32>
    %243 = vector.extract_strided_slice %239 {offsets = [0, 192], sizes = [8, 64], strides = [1, 1]} : vector<8x256xf32> to vector<8x64xf32>
    %244 = arith.mulf %241, %224 : vector<8x64xf32>
    %245 = arith.mulf %240, %243 : vector<8x64xf32>
    %246 = arith.addf %244, %245 : vector<8x64xf32>
    %247 = math.tanh %246 : vector<8x64xf32>
    %248 = arith.mulf %242, %247 : vector<8x64xf32>
    %cst_24 = arith.constant dense<0.000000e+00> : vector<8x514xf32>
    %249 = tpu.matmul %248, %9, %cst_24 {dimension_numbers = #tpu.dot_dimension_numbers<[1], [0], [0], [1], [0, 0, 1, 1], [], []>} : vector<8x64xf32>, vector<64x514xf32>, vector<8x514xf32> -> vector<8x514xf32>
    %250 = vector.extract_strided_slice %249 {offsets = [0, 0], sizes = [8, 256], strides = [1, 1]} : vector<8x514xf32> to vector<8x256xf32>
    %251 = vector.extract_strided_slice %249 {offsets = [0, 512], sizes = [8, 2], strides = [1, 1]} : vector<8x514xf32> to vector<8x2xf32>
    %252 = arith.addf %251, %21 : vector<8x2xf32>
    %253 = arith.addf %231, %252 : vector<8x2xf32>
    %254 = vector.extract_strided_slice %249 {offsets = [0, 256], sizes = [8, 256], strides = [1, 1]} : vector<8x514xf32> to vector<8x256xf32>
    %255 = arith.addf %234, %254 : vector<8x256xf32>
    %256 = arith.addf %255, %23 : vector<8x256xf32>
    %257 = arith.addf %256, %250 : vector<8x256xf32>
    %258 = arith.mulf %257, %17 : vector<8x256xf32>
    %259 = math.tanh %258 : vector<8x256xf32>
    %260 = arith.mulf %259, %17 : vector<8x256xf32>
    %261 = arith.addf %260, %19 : vector<8x256xf32>
    %262 = vector.extract_strided_slice %261 {offsets = [0, 0], sizes = [8, 64], strides = [1, 1]} : vector<8x256xf32> to vector<8x64xf32>
    %263 = vector.extract_strided_slice %261 {offsets = [0, 64], sizes = [8, 64], strides = [1, 1]} : vector<8x256xf32> to vector<8x64xf32>
    %264 = vector.extract_strided_slice %261 {offsets = [0, 128], sizes = [8, 64], strides = [1, 1]} : vector<8x256xf32> to vector<8x64xf32>
    %265 = vector.extract_strided_slice %261 {offsets = [0, 192], sizes = [8, 64], strides = [1, 1]} : vector<8x256xf32> to vector<8x64xf32>
    %266 = arith.mulf %263, %246 : vector<8x64xf32>
    %267 = arith.mulf %262, %265 : vector<8x64xf32>
    %268 = arith.addf %266, %267 : vector<8x64xf32>
    %269 = math.tanh %268 : vector<8x64xf32>
    %270 = arith.mulf %264, %269 : vector<8x64xf32>
    %cst_25 = arith.constant dense<0.000000e+00> : vector<8x514xf32>
    %271 = tpu.matmul %270, %9, %cst_25 {dimension_numbers = #tpu.dot_dimension_numbers<[1], [0], [0], [1], [0, 0, 1, 1], [], []>} : vector<8x64xf32>, vector<64x514xf32>, vector<8x514xf32> -> vector<8x514xf32>
    %272 = vector.extract_strided_slice %271 {offsets = [0, 0], sizes = [8, 256], strides = [1, 1]} : vector<8x514xf32> to vector<8x256xf32>
    %273 = vector.extract_strided_slice %271 {offsets = [0, 512], sizes = [8, 2], strides = [1, 1]} : vector<8x514xf32> to vector<8x2xf32>
    %274 = arith.addf %273, %21 : vector<8x2xf32>
    %275 = arith.addf %253, %274 : vector<8x2xf32>
    %276 = vector.extract_strided_slice %271 {offsets = [0, 256], sizes = [8, 256], strides = [1, 1]} : vector<8x514xf32> to vector<8x256xf32>
    %277 = arith.addf %256, %276 : vector<8x256xf32>
    %278 = arith.addf %277, %23 : vector<8x256xf32>
    %279 = arith.addf %278, %272 : vector<8x256xf32>
    %280 = arith.mulf %279, %17 : vector<8x256xf32>
    %281 = math.tanh %280 : vector<8x256xf32>
    %282 = arith.mulf %281, %17 : vector<8x256xf32>
    %283 = arith.addf %282, %19 : vector<8x256xf32>
    %284 = vector.extract_strided_slice %283 {offsets = [0, 0], sizes = [8, 64], strides = [1, 1]} : vector<8x256xf32> to vector<8x64xf32>
    %285 = vector.extract_strided_slice %283 {offsets = [0, 64], sizes = [8, 64], strides = [1, 1]} : vector<8x256xf32> to vector<8x64xf32>
    %286 = vector.extract_strided_slice %283 {offsets = [0, 128], sizes = [8, 64], strides = [1, 1]} : vector<8x256xf32> to vector<8x64xf32>
    %287 = vector.extract_strided_slice %283 {offsets = [0, 192], sizes = [8, 64], strides = [1, 1]} : vector<8x256xf32> to vector<8x64xf32>
    %288 = arith.mulf %285, %268 : vector<8x64xf32>
    %289 = arith.mulf %284, %287 : vector<8x64xf32>
    %290 = arith.addf %288, %289 : vector<8x64xf32>
    %291 = math.tanh %290 : vector<8x64xf32>
    %292 = arith.mulf %286, %291 : vector<8x64xf32>
    %cst_26 = arith.constant dense<0.000000e+00> : vector<8x514xf32>
    %293 = tpu.matmul %292, %9, %cst_26 {dimension_numbers = #tpu.dot_dimension_numbers<[1], [0], [0], [1], [0, 0, 1, 1], [], []>} : vector<8x64xf32>, vector<64x514xf32>, vector<8x514xf32> -> vector<8x514xf32>
    %294 = vector.extract_strided_slice %293 {offsets = [0, 0], sizes = [8, 256], strides = [1, 1]} : vector<8x514xf32> to vector<8x256xf32>
    %295 = vector.extract_strided_slice %293 {offsets = [0, 512], sizes = [8, 2], strides = [1, 1]} : vector<8x514xf32> to vector<8x2xf32>
    %296 = arith.addf %295, %21 : vector<8x2xf32>
    %297 = arith.addf %275, %296 : vector<8x2xf32>
    %298 = vector.extract_strided_slice %293 {offsets = [0, 256], sizes = [8, 256], strides = [1, 1]} : vector<8x514xf32> to vector<8x256xf32>
    %299 = arith.addf %278, %298 : vector<8x256xf32>
    %300 = arith.addf %299, %23 : vector<8x256xf32>
    %301 = arith.addf %300, %294 : vector<8x256xf32>
    %302 = arith.mulf %301, %17 : vector<8x256xf32>
    %303 = math.tanh %302 : vector<8x256xf32>
    %304 = arith.mulf %303, %17 : vector<8x256xf32>
    %305 = arith.addf %304, %19 : vector<8x256xf32>
    %306 = vector.extract_strided_slice %305 {offsets = [0, 0], sizes = [8, 64], strides = [1, 1]} : vector<8x256xf32> to vector<8x64xf32>
    %307 = vector.extract_strided_slice %305 {offsets = [0, 64], sizes = [8, 64], strides = [1, 1]} : vector<8x256xf32> to vector<8x64xf32>
    %308 = vector.extract_strided_slice %305 {offsets = [0, 128], sizes = [8, 64], strides = [1, 1]} : vector<8x256xf32> to vector<8x64xf32>
    %309 = vector.extract_strided_slice %305 {offsets = [0, 192], sizes = [8, 64], strides = [1, 1]} : vector<8x256xf32> to vector<8x64xf32>
    %310 = arith.mulf %307, %290 : vector<8x64xf32>
    %311 = arith.mulf %306, %309 : vector<8x64xf32>
    %312 = arith.addf %310, %311 : vector<8x64xf32>
    %313 = math.tanh %312 : vector<8x64xf32>
    %314 = arith.mulf %308, %313 : vector<8x64xf32>
    %cst_27 = arith.constant dense<0.000000e+00> : vector<8x514xf32>
    %315 = tpu.matmul %314, %9, %cst_27 {dimension_numbers = #tpu.dot_dimension_numbers<[1], [0], [0], [1], [0, 0, 1, 1], [], []>} : vector<8x64xf32>, vector<64x514xf32>, vector<8x514xf32> -> vector<8x514xf32>
    %316 = vector.extract_strided_slice %315 {offsets = [0, 0], sizes = [8, 256], strides = [1, 1]} : vector<8x514xf32> to vector<8x256xf32>
    %317 = vector.extract_strided_slice %315 {offsets = [0, 512], sizes = [8, 2], strides = [1, 1]} : vector<8x514xf32> to vector<8x2xf32>
    %318 = arith.addf %317, %21 : vector<8x2xf32>
    %319 = arith.addf %297, %318 : vector<8x2xf32>
    %320 = vector.extract_strided_slice %315 {offsets = [0, 256], sizes = [8, 256], strides = [1, 1]} : vector<8x514xf32> to vector<8x256xf32>
    %321 = arith.addf %300, %320 : vector<8x256xf32>
    %322 = arith.addf %321, %23 : vector<8x256xf32>
    %323 = arith.addf %322, %316 : vector<8x256xf32>
    %324 = arith.mulf %323, %17 : vector<8x256xf32>
    %325 = math.tanh %324 : vector<8x256xf32>
    %326 = arith.mulf %325, %17 : vector<8x256xf32>
    %327 = arith.addf %326, %19 : vector<8x256xf32>
    %328 = vector.extract_strided_slice %327 {offsets = [0, 0], sizes = [8, 64], strides = [1, 1]} : vector<8x256xf32> to vector<8x64xf32>
    %329 = vector.extract_strided_slice %327 {offsets = [0, 64], sizes = [8, 64], strides = [1, 1]} : vector<8x256xf32> to vector<8x64xf32>
    %330 = vector.extract_strided_slice %327 {offsets = [0, 128], sizes = [8, 64], strides = [1, 1]} : vector<8x256xf32> to vector<8x64xf32>
    %331 = vector.extract_strided_slice %327 {offsets = [0, 192], sizes = [8, 64], strides = [1, 1]} : vector<8x256xf32> to vector<8x64xf32>
    %332 = arith.mulf %329, %312 : vector<8x64xf32>
    %333 = arith.mulf %328, %331 : vector<8x64xf32>
    %334 = arith.addf %332, %333 : vector<8x64xf32>
    %335 = math.tanh %334 : vector<8x64xf32>
    %336 = arith.mulf %330, %335 : vector<8x64xf32>
    %cst_28 = arith.constant dense<0.000000e+00> : vector<8x514xf32>
    %337 = tpu.matmul %336, %9, %cst_28 {dimension_numbers = #tpu.dot_dimension_numbers<[1], [0], [0], [1], [0, 0, 1, 1], [], []>} : vector<8x64xf32>, vector<64x514xf32>, vector<8x514xf32> -> vector<8x514xf32>
    %338 = vector.extract_strided_slice %337 {offsets = [0, 512], sizes = [8, 2], strides = [1, 1]} : vector<8x514xf32> to vector<8x2xf32>
    %339 = arith.addf %338, %21 : vector<8x2xf32>
    %340 = arith.addf %319, %339 : vector<8x2xf32>
    %341 = vector.shape_cast %187 : vector<8x2xf32> to vector<1x8x2xf32>
    %342 = vector.shape_cast %209 : vector<8x2xf32> to vector<1x8x2xf32>
    %343 = vector.shape_cast %231 : vector<8x2xf32> to vector<1x8x2xf32>
    %344 = vector.shape_cast %253 : vector<8x2xf32> to vector<1x8x2xf32>
    %345 = vector.shape_cast %275 : vector<8x2xf32> to vector<1x8x2xf32>
    %346 = vector.shape_cast %297 : vector<8x2xf32> to vector<1x8x2xf32>
    %347 = vector.shape_cast %319 : vector<8x2xf32> to vector<1x8x2xf32>
    %348 = vector.shape_cast %340 : vector<8x2xf32> to vector<1x8x2xf32>
    %349 = tpu.concatenate %341, %342, %343, %344, %345, %346, %347, %348 in 0 : vector<1x8x2xf32>, vector<1x8x2xf32>, vector<1x8x2xf32>, vector<1x8x2xf32>, vector<1x8x2xf32>, vector<1x8x2xf32>, vector<1x8x2xf32>, vector<1x8x2xf32> -> vector<8x8x2xf32>
    %c0_29 = arith.constant 0 : index
    %c0_30 = arith.constant 0 : index
    %c0_31 = arith.constant 0 : index
    %350 = vector.load %arg4[%c0_29, %c0_30, %c0_31] : memref<8x8x2xf32, #tpu.memory_space<vmem>>, vector<8x8x2xf32>
    tpu.vector_store %arg4[%c0_29, %c0_30, %c0_31], %349 {strides = array<i32>} : memref<8x8x2xf32, #tpu.memory_space<vmem>>, vector<8x8x2xf32>,
    %351 = vector.shape_cast %186 : vector<8x2xf32> to vector<1x8x2xf32>
    %352 = vector.shape_cast %208 : vector<8x2xf32> to vector<1x8x2xf32>
    %353 = vector.shape_cast %230 : vector<8x2xf32> to vector<1x8x2xf32>
    %354 = vector.shape_cast %252 : vector<8x2xf32> to vector<1x8x2xf32>
    %355 = vector.shape_cast %274 : vector<8x2xf32> to vector<1x8x2xf32>
    %356 = vector.shape_cast %296 : vector<8x2xf32> to vector<1x8x2xf32>
    %357 = vector.shape_cast %318 : vector<8x2xf32> to vector<1x8x2xf32>
    %358 = vector.shape_cast %339 : vector<8x2xf32> to vector<1x8x2xf32>
    %359 = tpu.concatenate %351, %352, %353, %354, %355, %356, %357, %358 in 0 : vector<1x8x2xf32>, vector<1x8x2xf32>, vector<1x8x2xf32>, vector<1x8x2xf32>, vector<1x8x2xf32>, vector<1x8x2xf32>, vector<1x8x2xf32>, vector<1x8x2xf32> -> vector<8x8x2xf32>
    %c0_32 = arith.constant 0 : index
    %c0_33 = arith.constant 0 : index
    %c0_34 = arith.constant 0 : index
    %360 = vector.load %arg5[%c0_32, %c0_33, %c0_34] : memref<8x8x2xf32, #tpu.memory_space<vmem>>, vector<8x8x2xf32>
    tpu.vector_store %arg5[%c0_32, %c0_33, %c0_34], %359 {strides = array<i32>} : memref<8x8x2xf32, #tpu.memory_space<vmem>>, vector<8x8x2xf32>,
    return
  }
  func.func @transform_0(%arg0: i32) -> (i32, i32, i32) {
    %c0_i32 = arith.constant 0 : i32
    %c0_i32_0 = arith.constant 0 : i32
    %c0_i32_1 = arith.constant 0 : i32
    return %c0_i32, %arg0, %c0_i32_0 : i32, i32, i32
  }
  func.func @transform_1(%arg0: i32) -> (i32, i32) {
    %c0_i32 = arith.constant 0 : i32
    %c0_i32_0 = arith.constant 0 : i32
    %c0_i32_1 = arith.constant 0 : i32
    return %c0_i32, %c0_i32_0 : i32, i32
  }
  func.func @transform_2(%arg0: i32) -> (i32, i32) {
    %c0_i32 = arith.constant 0 : i32
    %c0_i32_0 = arith.constant 0 : i32
    %c0_i32_1 = arith.constant 0 : i32
    return %c0_i32, %c0_i32_0 : i32, i32
  }
  func.func @transform_3(%arg0: i32) -> (i32, i32, i32) {
    %c0_i32 = arith.constant 0 : i32
    %c0_i32_0 = arith.constant 0 : i32
    %c0_i32_1 = arith.constant 0 : i32
    return %c0_i32, %arg0, %c0_i32_0 : i32, i32, i32
  }
  func.func @transform_4(%arg0: i32) -> (i32, i32, i32) {
    %c0_i32 = arith.constant 0 : i32
    %c0_i32_0 = arith.constant 0 : i32
    %c0_i32_1 = arith.constant 0 : i32
    return %c0_i32, %arg0, %c0_i32_0 : i32, i32, i32
  }
}

</mosaic_0001>

<bundles_post_ra>
// kernel: trajectory_predictor.1
= control target key start
LH: loop header
LB: loop body
LE: loop exit
PB: predicated region body
PF: predicated region fallthrough
CT: control target
= control target key end

     0   :  { %v4028_v0 = vmov 0   ;;  %vm205_vm0 = vcmask 1041408   ;;  %v4029_v4 = vmov 0.0   ;;  %vm180_vm1 = vcmask 15360   ;;  %s4031_s21 = smov 64   ;;  %s5055_s0 = inlined_call_operand.vmem [shape: f32[8,8,2], index: 0, kind: input, shape index: {}]   ;;  %s5056_s1 = inlined_call_operand.vmem [shape: f32[72,256], index: 1, kind: input, shape index: {}]   ;;  %s5057_s2 = inlined_call_operand.vmem [shape: f32[64,770], index: 2, kind: input, shape index: {}]   ;;  %s5058_s4 = inlined_call_operand.vmem [shape: f32[8,8,2], index: 4, kind: output, shape index: {1}]   ;;  %s5059_s3 = inlined_call_operand.vmem [shape: f32[8,8,2], index: 3, kind: output, shape index: {0}]  }
   0x1   :  { %3928 = vset.pattern.permute.xlu0 %v4028_v0  ;;  %v116_v1 = vld [vmem:[%s5055_s0] sm:$0xff]  ;;  %v4065_v2 = vld [vmem:[%s5056_s1 + $0x8] sm:$0xff]  ;;  %3929 = vset.pattern.permute.xlu1 %v4028_v0  ;;  %v96_v7 = vlaneseq  ;;  %vm90_vm2 = vcmask 523264   ;;  %v4030_v11 = vmov 1.0   ;;  %v4105_v24 = vld [vmem:[%s5055_s0 + $0x10] sm:$0xff]  ;;  %vm4033_vm3 = vmmov 0  }
   0x2   :  { %126 = vperm.xlu0 %3928, %v116_v1   ;;  %3154 = vmatprep.subr.msk.mxu0 %vm205_vm0, %v4065_v2  ;;  %v4072_v3 = vld [vmem:[%s5056_s1] sm:$0xff]  ;;  %v91_v12 = vsel %vm90_vm2, 0.5, %v4030_v11  ;;  %v92_v19 = vsel %vm90_vm2, 0.5, %v4029_v4  ;;  %v4117_v26 = vld [vmem:[%s5055_s0 + $0x30] sm:$0xff]  ;;  %v117_v35 = vld [vmem:[%s5055_s0 + $0x8] sm:$0xff] }
   0x3   :  { %3155 = vmatpush1.msk.msra.mxu0 %vm205_vm0, %v4072_v3  ;;  %276 = vmatprep.mubr.f32.mxu0 %v4029_v4  ;;  %v4080_v8 = vshrl.u32 %v96_v7, 7  ;;  %v4111_v25 = vld [vmem:[%s5055_s0 + $0x20] sm:$0xff]  ;;  %v119_v36 = vld [vmem:[%s5055_s0 + $0x18] sm:$0xff]  ;;  %v4134_v37 = vld [vmem:[%s5055_s0 + $0x28] sm:$0xff] }
   0x4   :  { %1124 = vmatprep.mubr.f32.mxu1 %v4029_v4  ;;  %v4140_v38 = vld [vmem:[%s5055_s0 + $0x38] sm:$0xff]  ;;  %v21_v40 = vld [vmem:[%s5056_s1 + $0x28] sm:$0xff]  ;;  %v18_v41 = vld [vmem:[%s5056_s1 + $0x10] sm:$0xff] }
   0x5   :  { %v174_v9 = vsub.s32 2, %v4080_v8  ;;  %v98_v10 = vsub.s32 0, %v4080_v8  ;;  %v19_v39 = vld [vmem:[%s5056_s1 + $0x18] sm:$0xff]  ;;  %v20_v43 = vld [vmem:[%s5056_s1 + $0x20] sm:$0xff]  ;;  %v25_v46 = vld [vmem:[%s5056_s1 + $0x48] sm:$0xff] }
   0x6   :  { %v4152_v42 = vpack.c.bf16 %v21_v40, %v19_v39  ;;  %v4157_v44 = vpack.c.bf16 %v20_v43, %v18_v41  ;;  %v23_v45 = vld [vmem:[%s5056_s1 + $0x38] sm:$0xff]  ;;  %v22_v47 = vld [vmem:[%s5056_s1 + $0x30] sm:$0xff]  ;;  %v24_v49 = vld [vmem:[%s5056_s1 + $0x40] sm:$0xff] }
   0x7   :  { %v4086_v13 = vrot.slane %v4065_v2, %v174_v9  ;;  %v4088_v14 = vrot.slane %v91_v12, %v98_v10  ;;  %v4094_v20 = vrot.slane %v92_v19, %v98_v10  ;;  %v4121_v27 = vrot.slane %v4072_v3, %v174_v9  ;;  %v27_v50 = vld [vmem:[%s5056_s1 + $0x58] sm:$0xff]  ;;  %v29_v51 = vld [vmem:[%s5056_s1 + $0x68] sm:$0xff]  ;;  %v26_v54 = vld [vmem:[%s5056_s1 + $0x50] sm:$0xff] }
   0x8   :  { %3423 = vmatprep.subr.bf16.mxu0 %v4152_v42  ;;  %v4170_v48 = vpack.c.bf16 %v25_v46, %v23_v45  ;;  %v4181_v52 = vpack.c.bf16 %v24_v49, %v22_v47  ;;  %v4183_v53 = vpack.c.bf16 %v29_v51, %v27_v50  ;;  %v28_v55 = vld [vmem:[%s5056_s1 + $0x60] sm:$0xff]  ;;  %v31_v56 = vld [vmem:[%s5056_s1 + $0x78] sm:$0xff]  ;;  %v33_v57 = vld [vmem:[%s5056_s1 + $0x88] sm:$0xff] }
   0x9   :  { %v4199_v58 = vpack.c.bf16 %v28_v55, %v26_v54  ;;  %v4202_v59 = vpack.c.bf16 %v33_v57, %v31_v56  ;;  %v30_v60 = vld [vmem:[%s5056_s1 + $0x70] sm:$0xff]  ;;  %v32_v61 = vld [vmem:[%s5056_s1 + $0x80] sm:$0xff] }
   0xa   :  { %v4211_v62 = vpack.c.bf16 %v32_v61, %v30_v60 }
  0x81   :  { %v127_v5 = vpop.permute.xlu0 %126 }
  0x82   :  { %v164_v6 = vsub.f32 %v116_v1, %v127_v5 }
  0x84   :  { %3156 = vmatmul.mubr.msk.f32.vlgmr.msra.gmra.mrb[0].mxu0 %vm180_vm1, %v164_v6 }
  0x85   :  { %282 = vmatprep.mubr.f32.mxu0 %v4029_v4  ;;  %3425 = vmatpush1.bf16.msra.mxu0 %v4157_v44 }
  0x86   :  { %3427 = vmatprep.subr.bf16.mxu0 %v4170_v48 }
  0x89   :  { %3429 = vmatpush1.bf16.msra.mxu0 %v4181_v52 }
  0x8a   :  { %3431 = vmatprep.subr.bf16.mxu0 %v4183_v53 }
  0x8d   :  { %3433 = vmatpush1.bf16.msra.mxu0 %v4199_v58 }
  0x8e   :  { %3435 = vmatprep.subr.bf16.mxu0 %v4202_v59 }
  0x91   :  { %3437 = vmatpush1.bf16.msra.mxu0 %v4211_v62 }
  0x92   :  { %3439 = vmatprep.subr.bf16.mxu0 %v4152_v42 }
 0x157   :  { %v278_v15 = vpop.f32.mrb[0].mxu0 }
 0x158   :  { %v280_v16 = vpop.f32.mrb[1].mxu0  ;;  %v279_v28 = vadd.f32 %v278_v15, %v4121_v27 }
 0x159   :  { %v281_v17 = vadd.f32 %v280_v16, %v4086_v13 }
 0x15a   :  { %v325_v29 = vmul.f32 0.5, %v279_v28 }
 0x15b   :  { %v326_v18 = vmul.f32 %v281_v17, %v4088_v14 }
 0x15d   :  { %3930 = vtanh.f32 %v326_v18 }
 0x15e   :  { %3932 = vtanh.f32 %v325_v29 }
 0x167   :  { %v3931_v21 = vpop.eup %3930 }
 0x168   :  { %v330_v22 = vmul.f32 %v3931_v21, %v4088_v14  ;;  %v3933_v30 = vpop.eup %3932 }
 0x169   :  { %v329_v31 = vmul.f32 0.5, %v3933_v30 }
 0x16a   :  { %v4098_v23 = vadd.f32 %v330_v22, %v4094_v20 }
 0x16b   :  { %v331_v32 = vadd.f32 0.5, %v329_v31 }
 0x16c   :  { %335 = vrot.lane.b32.xlu0 %v4098_v23, %s4031_s21 }
 0x16d   :  { %v333_v63 = vmul.f32 0.0, %v331_v32 }
 0x170   :  { %136 = vperm.xlu0 %3928, %v4105_v24  }
 0x174   :  { %146 = vperm.xlu0 %3928, %v4111_v25  }
 0x178   :  { %156 = vperm.xlu0 %3928, %v4117_v26  }
 0x1de   :  { %v336_v33 = vpop.permute.xlu0 %335 }
 0x1df   :  { %v338_v34 = vmul.f32 %v336_v33, %v331_v32 }
 0x1e1   :  { %340 = vrot.lane.b32.xlu1 %v338_v34, %s4031_s21 }
 0x1e5   :  { %131 = vperm.xlu1 %3929, %v117_v35  }
 0x1e9   :  { %141 = vperm.xlu1 %3929, %v119_v36  }
 0x1ed   :  { %151 = vperm.xlu1 %3929, %v4134_v37  }
 0x1ef   :  { %v137_v9 = vpop.permute.xlu0 %136 }
 0x1f0   :  { %v166_v11 = vsub.f32 %v4105_v24, %v137_v9 }
 0x1f1   :  { %161 = vperm.xlu1 %3929, %v4140_v38  }
 0x1f3   :  { %v147_v15 = vpop.permute.xlu0 %146 }
 0x1f4   :  { %v168_v17 = vsub.f32 %v4111_v25, %v147_v15 }
 0x1f7   :  { %v157_v19 = vpop.permute.xlu0 %156 }
 0x1f8   :  { %v170_v22 = vsub.f32 %v4117_v26, %v157_v19 }
 0x253   :  { %v341_v0 = vpop.permute.xlu1 %340 }
 0x254   :  { %v343_v1 = vadd.f32 %v341_v0, %v333_v63 }
 0x256   :  { %3934 = vtanh.f32 %v343_v1 }
 0x260   :  { %v3935_v5 = vpop.eup %3934 }
 0x261   :  { %346 = vrot.lane.b32.xlu0 %v3935_v5, %s4031_s21 }
 0x264   :  { %v132_v6 = vpop.permute.xlu1 %131 }
 0x265   :  { %v165_v7 = vsub.f32 %v117_v35, %v132_v6 }
 0x267   :  { %3157 = vmatmul.mubr.msk.f32.gmra.mrb[2].mxu0 %vm180_vm1, %v165_v7 }
 0x268   :  { %288 = vmatprep.mubr.f32.mxu0 %v4029_v4  ;;  %v142_v10 = vpop.permute.xlu1 %141 }
 0x269   :  { %v167_v12 = vsub.f32 %v119_v36, %v142_v10 }
 0x26b   :  { %3158 = vmatmul.mubr.msk.f32.gmra.mrb[4].mxu0 %vm180_vm1, %v166_v11 }
 0x26c   :  { %294 = vmatprep.mubr.f32.mxu0 %v4029_v4  ;;  %v152_v16 = vpop.permute.xlu1 %151 }
 0x26d   :  { %v169_v18 = vsub.f32 %v4134_v37, %v152_v16 }
 0x26f   :  { %3159 = vmatmul.mubr.msk.f32.gmra.mrb[6].mxu0 %vm180_vm1, %v167_v12 }
 0x270   :  { %300 = vmatprep.mubr.f32.mxu0 %v4029_v4  ;;  %v162_v21 = vpop.permute.xlu1 %161 }
 0x271   :  { %v4233_v24 = vsub.f32 %v4140_v38, %v162_v21 }
 0x273   :  { %3160 = vmatmul.mubr.msk.f32.gmra.mrb[8].mxu0 %vm180_vm1, %v168_v17 }
 0x274   :  { %306 = vmatprep.mubr.f32.mxu0 %v4029_v4 }
 0x277   :  { %3161 = vmatmul.mubr.msk.f32.gmra.mrb[10].mxu0 %vm180_vm1, %v169_v18 }
 0x278   :  { %312 = vmatprep.mubr.f32.mxu0 %v4029_v4 }
 0x27b   :  { %3162 = vmatmul.mubr.msk.f32.gmra.mrb[12].mxu0 %vm180_vm1, %v170_v22 }
 0x27c   :  { %318 = vmatprep.mubr.f32.mxu0 %v4029_v4 }
 0x27f   :  { %3163 = vmatmul.mubr.msk.f32.gmra.mrb[14].mxu0 %vm180_vm1, %v4233_v24 }
 0x280   :  { %417 = vmatprep.mubr.f32.mxu0 %v4029_v4 }
 0x2d3   :  { %v347_v25 = vpop.permute.xlu0 %346 }
 0x2d4   :  { %v349_v28 = vmul.f32 %v347_v25, %v4098_v23 }
 0x2d6   :  { %3164 = vmatmul.mubr.msk.f32.vlgmr.msra.gmra.mrb[2].mxu0 %vm90_vm2, %v349_v28 }
 0x2d7   :  { %3441 = vmatpush1.bf16.msra.mxu0 %v4157_v44  ;;  %518 = vmatprep.mubr.f32.mxu0 %v4029_v4 }
 0x2d8   :  { %3443 = vmatprep.subr.bf16.mxu0 %v4170_v48 }
 0x2db   :  { %3445 = vmatpush1.bf16.msra.mxu0 %v4181_v52 }
 0x2dc   :  { %3447 = vmatprep.subr.bf16.mxu0 %v4183_v53 }
 0x2df   :  { %3449 = vmatpush1.bf16.msra.mxu0 %v4199_v58 }
 0x2e0   :  { %3451 = vmatprep.subr.bf16.mxu0 %v4202_v59 }
 0x2e3   :  { %3453 = vmatpush1.bf16.msra.mxu0 %v4211_v62 }
 0x2e4   :  { %3455 = vmatprep.subr.bf16.mxu0 %v4152_v42 }
 0x3a9   :  { %v419_v23 = vpop.f32.mrb[2].mxu0 }
 0x3aa   :  { %v421_v26 = vpop.f32.mrb[3].mxu0  ;;  %v3886_v34 = vadd.f32 %v419_v23, %v4121_v27 }
 0x3ab   :  { %v3887_v29 = vadd.f32 %v421_v26, %v4086_v13 }
 0x3ac   :  { %v426_v35 = vmul.f32 0.5, %v3886_v34 }
 0x3ad   :  { %v427_v30 = vmul.f32 %v3887_v29, %v4088_v14 }
 0x3af   :  { %3936 = vtanh.f32 %v427_v30 }
 0x3b0   :  { %3938 = vtanh.f32 %v426_v35 }
 0x3b9   :  { %v3937_v31 = vpop.eup %3936 }
 0x3ba   :  { %v431_v32 = vmul.f32 %v3937_v31, %v4088_v14  ;;  %v3939_v36 = vpop.eup %3938 }
 0x3bb   :  { %v430_v37 = vmul.f32 0.5, %v3939_v36 }
 0x3bc   :  { %v433_v33 = vadd.f32 %v431_v32, %v4094_v20 }
 0x3bd   :  { %v432_v38 = vadd.f32 0.5, %v430_v37 }
 0x3be   :  { %436 = vrot.lane.b32.xlu1 %v433_v33, %s4031_s21 }
 0x3bf   :  { %v434_v41 = vmul.f32 %v432_v38, %v343_v1 }
 0x430   :  { %v437_v39 = vpop.permute.xlu1 %436 }
 0x431   :  { %v439_v40 = vmul.f32 %v437_v39, %v432_v38 }
 0x433   :  { %441 = vrot.lane.b32.xlu0 %v439_v40, %s4031_s21 }
 0x4a5   :  { %v442_v43 = vpop.permute.xlu0 %441 }
 0x4a6   :  { %v444_v45 = vadd.f32 %v442_v43, %v434_v41 }
 0x4a8   :  { %3940 = vtanh.f32 %v444_v45 }
 0x4b2   :  { %v3941_v46 = vpop.eup %3940 }
 0x4b3   :  { %447 = vrot.lane.b32.xlu1 %v3941_v46, %s4031_s21 }
 0x525   :  { %v448_v47 = vpop.permute.xlu1 %447 }
 0x526   :  { %v450_v49 = vmul.f32 %v448_v47, %v433_v33 }
 0x528   :  { %3165 = vmatmul.mubr.msk.f32.vlgmr.msra.gmra.mrb[4].mxu0 %vm90_vm2, %v450_v49 }
 0x529   :  { %3457 = vmatpush1.bf16.msra.mxu0 %v4157_v44  ;;  %619 = vmatprep.mubr.f32.mxu0 %v4029_v4 }
 0x52a   :  { %3459 = vmatprep.subr.bf16.mxu0 %v4170_v48 }
 0x52d   :  { %3461 = vmatpush1.bf16.msra.mxu0 %v4181_v52 }
 0x52e   :  { %3463 = vmatprep.subr.bf16.mxu0 %v4183_v53 }
 0x531   :  { %3465 = vmatpush1.bf16.msra.mxu0 %v4199_v58 }
 0x532   :  { %3467 = vmatprep.subr.bf16.mxu0 %v4202_v59 }
 0x535   :  { %3469 = vmatpush1.bf16.msra.mxu0 %v4211_v62 }
 0x536   :  { %3471 = vmatprep.subr.bf16.mxu0 %v4152_v42 }
 0x5fb   :  { %v520_v50 = vpop.f32.mrb[4].mxu0 }
 0x5fc   :  { %v522_v51 = vpop.f32.mrb[5].mxu0  ;;  %v3888_v61 = vadd.f32 %v520_v50, %v4121_v27 }
 0x5fd   :  { %v3889_v54 = vadd.f32 %v522_v51, %v4086_v13 }
 0x5fe   :  { %v527_v63 = vmul.f32 0.5, %v3888_v61 }
 0x5ff   :  { %v528_v55 = vmul.f32 %v3889_v54, %v4088_v14 }
 0x601   :  { %3942 = vtanh.f32 %v528_v55 }
 0x602   :  { %3944 = vtanh.f32 %v527_v63 }
 0x60b   :  { %v3943_v56 = vpop.eup %3942 }
 0x60c   :  { %v532_v57 = vmul.f32 %v3943_v56, %v4088_v14  ;;  %v3945_v0 = vpop.eup %3944 }
 0x60d   :  { %v531_v1 = vmul.f32 0.5, %v3945_v0 }
 0x60e   :  { %v534_v60 = vadd.f32 %v532_v57, %v4094_v20 }
 0x60f   :  { %v533_v5 = vadd.f32 0.5, %v531_v1 }
 0x610   :  { %537 = vrot.lane.b32.xlu0 %v534_v60, %s4031_s21 }
 0x611   :  { %v535_v9 = vmul.f32 %v533_v5, %v444_v45 }
 0x682   :  { %v538_v6 = vpop.permute.xlu0 %537 }
 0x683   :  { %v540_v7 = vmul.f32 %v538_v6, %v533_v5 }
 0x685   :  { %542 = vrot.lane.b32.xlu1 %v540_v7, %s4031_s21 }
 0x6f7   :  { %v543_v10 = vpop.permute.xlu1 %542 }
 0x6f8   :  { %v545_v11 = vadd.f32 %v543_v10, %v535_v9 }
 0x6fa   :  { %3946 = vtanh.f32 %v545_v11 }
 0x704   :  { %v3947_v12 = vpop.eup %3946 }
 0x705   :  { %548 = vrot.lane.b32.xlu0 %v3947_v12, %s4031_s21 }
 0x777   :  { %v549_v15 = vpop.permute.xlu0 %548 }
 0x778   :  { %v551_v16 = vmul.f32 %v549_v15, %v534_v60 }
 0x77a   :  { %3166 = vmatmul.mubr.msk.f32.vlgmr.msra.gmra.mrb[6].mxu0 %vm90_vm2, %v551_v16 }
 0x77b   :  { %3473 = vmatpush1.bf16.msra.mxu0 %v4157_v44  ;;  %720 = vmatprep.mubr.f32.mxu0 %v4029_v4 }
 0x77c   :  { %3475 = vmatprep.subr.bf16.mxu0 %v4170_v48 }
 0x77f   :  { %3477 = vmatpush1.bf16.msra.mxu0 %v4181_v52 }
 0x780   :  { %3479 = vmatprep.subr.bf16.mxu0 %v4183_v53 }
 0x783   :  { %3481 = vmatpush1.bf16.msra.mxu0 %v4199_v58 }
 0x784   :  { %3483 = vmatprep.subr.bf16.mxu0 %v4202_v59 }
 0x787   :  { %3485 = vmatpush1.bf16.msra.mxu0 %v4211_v62 }
 0x788   :  { %3487 = vmatprep.subr.bf16.mxu0 %v4152_v42 }
 0x84d   :  { %v621_v17 = vpop.f32.mrb[6].mxu0 }
 0x84e   :  { %v623_v18 = vpop.f32.mrb[7].mxu0  ;;  %v3890_v23 = vadd.f32 %v621_v17, %v4121_v27 }
 0x84f   :  { %v3891_v19 = vadd.f32 %v623_v18, %v4086_v13 }
 0x850   :  { %v628_v26 = vmul.f32 0.5, %v3890_v23 }
 0x851   :  { %v629_v21 = vmul.f32 %v3891_v19, %v4088_v14 }
 0x853   :  { %3948 = vtanh.f32 %v629_v21 }
 0x854   :  { %3950 = vtanh.f32 %v628_v26 }
 0x85d   :  { %v3949_v22 = vpop.eup %3948 }
 0x85e   :  { %v633_v25 = vmul.f32 %v3949_v22, %v4088_v14  ;;  %v3951_v29 = vpop.eup %3950 }
 0x85f   :  { %v632_v30 = vmul.f32 0.5, %v3951_v29 }
 0x860   :  { %v635_v28 = vadd.f32 %v633_v25, %v4094_v20 }
 0x861   :  { %v634_v31 = vadd.f32 0.5, %v632_v30 }
 0x862   :  { %638 = vrot.lane.b32.xlu1 %v635_v28, %s4031_s21 }
 0x863   :  { %v636_v34 = vmul.f32 %v634_v31, %v545_v11 }
 0x8d4   :  { %v639_v32 = vpop.permute.xlu1 %638 }
 0x8d5   :  { %v641_v33 = vmul.f32 %v639_v32, %v634_v31 }
 0x8d7   :  { %643 = vrot.lane.b32.xlu0 %v641_v33, %s4031_s21 }
 0x949   :  { %v644_v35 = vpop.permute.xlu0 %643 }
 0x94a   :  { %v646_v36 = vadd.f32 %v644_v35, %v636_v34 }
 0x94c   :  { %3952 = vtanh.f32 %v646_v36 }
 0x956   :  { %v3953_v37 = vpop.eup %3952 }
 0x957   :  { %649 = vrot.lane.b32.xlu1 %v3953_v37, %s4031_s21 }
 0x9c9   :  { %v650_v38 = vpop.permute.xlu1 %649 }
 0x9ca   :  { %v652_v39 = vmul.f32 %v650_v38, %v635_v28 }
 0x9cc   :  { %3167 = vmatmul.mubr.msk.f32.vlgmr.msra.gmra.mrb[8].mxu0 %vm90_vm2, %v652_v39 }
 0x9cd   :  { %3489 = vmatpush1.bf16.msra.mxu0 %v4157_v44  ;;  %821 = vmatprep.mubr.f32.mxu0 %v4029_v4 }
 0x9ce   :  { %3491 = vmatprep.subr.bf16.mxu0 %v4170_v48 }
 0x9d1   :  { %3493 = vmatpush1.bf16.msra.mxu0 %v4181_v52 }
 0x9d2   :  { %3495 = vmatprep.subr.bf16.mxu0 %v4183_v53 }
 0x9d5   :  { %3497 = vmatpush1.bf16.msra.mxu0 %v4199_v58 }
 0x9d6   :  { %3499 = vmatprep.subr.bf16.mxu0 %v4202_v59 }
 0x9d9   :  { %3501 = vmatpush1.bf16.msra.mxu0 %v4211_v62 }
 0x9da   :  { %3503 = vmatprep.subr.bf16.mxu0 %v4152_v42 }
 0xa9f   :  { %v722_v40 = vpop.f32.mrb[8].mxu0 }
 0xaa0   :  { %v724_v41 = vpop.f32.mrb[9].mxu0  ;;  %v3892_v50 = vadd.f32 %v722_v40, %v4121_v27 }
 0xaa1   :  { %v3893_v43 = vadd.f32 %v724_v41, %v4086_v13 }
 0xaa2   :  { %v729_v51 = vmul.f32 0.5, %v3892_v50 }
 0xaa3   :  { %v730_v45 = vmul.f32 %v3893_v43, %v4088_v14 }
 0xaa5   :  { %3954 = vtanh.f32 %v730_v45 }
 0xaa6   :  { %3956 = vtanh.f32 %v729_v51 }
 0xaaf   :  { %v3955_v46 = vpop.eup %3954 }
 0xab0   :  { %v734_v47 = vmul.f32 %v3955_v46, %v4088_v14  ;;  %v3957_v54 = vpop.eup %3956 }
 0xab1   :  { %v733_v55 = vmul.f32 0.5, %v3957_v54 }
 0xab2   :  { %v736_v49 = vadd.f32 %v734_v47, %v4094_v20 }
 0xab3   :  { %v735_v56 = vadd.f32 0.5, %v733_v55 }
 0xab4   :  { %739 = vrot.lane.b32.xlu0 %v736_v49, %s4031_s21 }
 0xab5   :  { %v737_v61 = vmul.f32 %v735_v56, %v646_v36 }
 0xb26   :  { %v740_v57 = vpop.permute.xlu0 %739 }
 0xb27   :  { %v742_v60 = vmul.f32 %v740_v57, %v735_v56 }
 0xb29   :  { %744 = vrot.lane.b32.xlu1 %v742_v60, %s4031_s21 }
 0xb9b   :  { %v745_v63 = vpop.permute.xlu1 %744 }
 0xb9c   :  { %v747_v0 = vadd.f32 %v745_v63, %v737_v61 }
 0xb9e   :  { %3958 = vtanh.f32 %v747_v0 }
 0xba8   :  { %v3959_v1 = vpop.eup %3958 }
 0xba9   :  { %750 = vrot.lane.b32.xlu0 %v3959_v1, %s4031_s21 }
 0xc1b   :  { %v751_v5 = vpop.permute.xlu0 %750 }
 0xc1c   :  { %v753_v6 = vmul.f32 %v751_v5, %v736_v49  ;;  %v35_v5 = vld [vmem:[%s5057_s2 + $0x8] sm:$0xff] }
 0xc1e   :  { %3168 = vmatmul.mubr.msk.f32.vlgmr.msra.gmra.mrb[10].mxu0 %vm90_vm2, %v753_v6  ;;  %v42_v6 = vld [vmem:[%s5057_s2 + $0x40] sm:$0xff] }
 0xc1f   :  { %3505 = vmatpush1.bf16.msra.mxu0 %v4157_v44  ;;  %922 = vmatprep.mubr.f32.mxu0 %v4029_v4 }
 0xc20   :  { %3507 = vmatprep.subr.bf16.mxu0 %v4170_v48 }
 0xc23   :  { %3509 = vmatpush1.bf16.msra.mxu0 %v4181_v52 }
 0xc24   :  { %3511 = vmatprep.subr.bf16.mxu0 %v4183_v53 }
 0xc27   :  { %3513 = vmatpush1.bf16.msra.mxu0 %v4199_v58 }
 0xc28   :  { %3515 = vmatprep.subr.bf16.mxu0 %v4202_v59 }
 0xc2b   :  { %3517 = vmatpush1.bf16.msra.mxu0 %v4211_v62 }
 0xc2c   :  { %3519 = vmatprep.subr.bf16.mxu0 %v4152_v42 }
 0xcf1   :  { %v823_v7 = vpop.f32.mrb[10].mxu0 }
 0xcf2   :  { %v825_v9 = vpop.f32.mrb[11].mxu0  ;;  %v3894_v17 = vadd.f32 %v823_v7, %v4121_v27  ;;  %v3534_v7 = vpack.c.bf16 %v42_v6, %v35_v5 }
 0xcf3   :  { %v3895_v10 = vadd.f32 %v825_v9, %v4086_v13  ;;  %v41_v9 = vld [vmem:[%s5057_s2 + $0x38] sm:$0xff] }
 0xcf4   :  { %v830_v18 = vmul.f32 0.5, %v3894_v17  ;;  %v55_v17 = vld [vmem:[%s5057_s2 + $0xa8] sm:$0xff]  ;;  %3535 = vmatprep.subr.bf16.mxu1 %v3534_v7 }
 0xcf5   :  { %v831_v11 = vmul.f32 %v3895_v10, %v4088_v14  ;;  %v49_v10 = vld [vmem:[%s5057_s2 + $0x78] sm:$0xff] }
 0xcf7   :  { %3960 = vtanh.f32 %v831_v11  ;;  %v56_v11 = vld [vmem:[%s5057_s2 + $0xb0] sm:$0xff] }
 0xcf8   :  { %3962 = vtanh.f32 %v830_v18  ;;  %v63_v18 = vld [vmem:[%s5057_s2 + $0xe8] sm:$0xff] }
 0xd01   :  { %v3961_v12 = vpop.eup %3960 }
 0xd02   :  { %v835_v15 = vmul.f32 %v3961_v12, %v4088_v14  ;;  %v3963_v19 = vpop.eup %3962 }
 0xd03   :  { %v834_v42 = vmul.f32 0.5, %v3963_v19  ;;  %v70_v19 = vld [vmem:[%s5057_s2 + $0x120] sm:$0xff] }
 0xd04   :  { %v837_v16 = vadd.f32 %v835_v15, %v4094_v20  ;;  %v3538_v15 = vpack.c.bf16 %v56_v11, %v49_v10 }
 0xd05   :  { %v836_v21 = vadd.f32 0.5, %v834_v42 }
 0xd06   :  { %840 = vrot.lane.b32.xlu1 %v837_v16, %s4031_s21 }
 0xd07   :  { %v838_v28 = vmul.f32 %v836_v21, %v747_v0 }
 0xd78   :  { %v841_v22 = vpop.permute.xlu1 %840 }
 0xd79   :  { %v843_v25 = vmul.f32 %v841_v22, %v836_v21  ;;  %v3542_v21 = vpack.c.bf16 %v70_v19, %v63_v18  ;;  %v62_v22 = vld [vmem:[%s5057_s2 + $0xe0] sm:$0xff] }
 0xd7b   :  { %845 = vrot.lane.b32.xlu0 %v843_v25, %s4031_s21  ;;  %v69_v25 = vld [vmem:[%s5057_s2 + $0x118] sm:$0xff] }
 0xded   :  { %v846_v23 = vpop.permute.xlu0 %845 }
 0xdee   :  { %v848_v26 = vadd.f32 %v846_v23, %v838_v28  ;;  %v77_v28 = vld [vmem:[%s5057_s2 + $0x158] sm:$0xff]  ;;  %v84_v23 = vld [vmem:[%s5057_s2 + $0x190] sm:$0xff] }
 0xdf0   :  { %3964 = vtanh.f32 %v848_v26 }
 0xdfa   :  { %v3965_v29 = vpop.eup %3964 }
 0xdfb   :  { %851 = vrot.lane.b32.xlu1 %v3965_v29, %s4031_s21  ;;  %v3546_v29 = vpack.c.bf16 %v84_v23, %v77_v28 }
 0xe6d   :  { %v852_v30 = vpop.permute.xlu1 %851 }
 0xe6e   :  { %v854_v31 = vmul.f32 %v852_v30, %v837_v16  ;;  %v48_v16 = vld [vmem:[%s5057_s2 + $0x70] sm:$0xff] }
 0xe6f   :  { %v3540_v42 = vpack.c.bf16 %v55_v17, %v48_v16  ;;  %v76_v30 = vld [vmem:[%s5057_s2 + $0x150] sm:$0xff] }
 0xe70   :  { %3169 = vmatmul.mubr.msk.f32.vlgmr.msra.gmra.mrb[12].mxu0 %vm90_vm2, %v854_v31  ;;  %v83_v31 = vld [vmem:[%s5057_s2 + $0x188] sm:$0xff] }
 0xe71   :  { %3521 = vmatpush1.bf16.msra.mxu0 %v4157_v44  ;;  %1023 = vmatprep.mubr.f32.mxu0 %v4029_v4 }
 0xe72   :  { %3523 = vmatprep.subr.bf16.mxu0 %v4170_v48 }
 0xe75   :  { %3525 = vmatpush1.bf16.msra.mxu0 %v4181_v52 }
 0xe76   :  { %3527 = vmatprep.subr.bf16.mxu0 %v4183_v53 }
 0xe79   :  { %3529 = vmatpush1.bf16.msra.mxu0 %v4199_v58 }
 0xe7a   :  { %3531 = vmatprep.subr.bf16.mxu0 %v4202_v59 }
 0xe7d   :  { %3533 = vmatpush1.bf16.msra.mxu0 %v4211_v62 }
 0xf43   :  { %v924_v32 = vpop.f32.mrb[12].mxu0 }
 0xf44   :  { %v926_v33 = vpop.f32.mrb[13].mxu0  ;;  %v3896_v53 = vadd.f32 %v924_v32, %v4121_v27  ;;  %v3548_v32 = vpack.c.bf16 %v83_v31, %v76_v30  ;;  %v46_v30 = vld [vmem:[%s5057_s2 + $0x60] sm:$0xff] }
 0xf45   :  { %v3897_v34 = vadd.f32 %v926_v33, %v4086_v13 }
 0xf46   :  { %v931_v58 = vmul.f32 0.5, %v3896_v53  ;;  %v43_v53 = vld [vmem:[%s5057_s2 + $0x48] sm:$0xff] }
 0xf47   :  { %v932_v44 = vmul.f32 %v3897_v34, %v4088_v14  ;;  %v37_v34 = vld [vmem:[%s5057_s2 + $0x18] sm:$0xff] }
 0xf49   :  { %3966 = vtanh.f32 %v932_v44  ;;  %v44_v44 = vld [vmem:[%s5057_s2 + $0x50] sm:$0xff] }
 0xf4a   :  { %3968 = vtanh.f32 %v931_v58 }
 0xf53   :  { %v3967_v35 = vpop.eup %3966 }
 0xf54   :  { %v936_v48 = vmul.f32 %v3967_v35, %v4088_v14  ;;  %v3969_v59 = vpop.eup %3968 }
 0xf55   :  { %v935_v62 = vmul.f32 0.5, %v3969_v59 }
 0xf56   :  { %v938_v52 = vadd.f32 %v936_v48, %v4094_v20  ;;  %v4413_v48 = vpack.c.bf16 %v44_v44, %v37_v34  ;;  %v4032_v44 = vmov 0.0|0.0  }
 0xf57   :  { %v937_v36 = vadd.f32 0.5, %v935_v62  ;;  %v51_v62 = vld [vmem:[%s5057_s2 + $0x88] sm:$0xff] }
 0xf58   :  { %941 = vrot.lane.b32.xlu0 %v938_v52, %s4031_s21  ;;  %3655 = vmatprep.subr.bf16.mxu0 %v4413_v48 }
 0xf59   :  { %v939_v39 = vmul.f32 %v937_v36, %v848_v26  ;;  %v3544_v26 = vpack.c.bf16 %v69_v25, %v62_v22 }
 0xfca   :  { %v942_v37 = vpop.permute.xlu0 %941 }
 0xfcb   :  { %v944_v38 = vmul.f32 %v942_v37, %v937_v36  ;;  %v58_v36 = vld [vmem:[%s5057_s2 + $0xc0] sm:$0xff] }
 0xfcc   :  { %v4432_v37 = vpack.c.bf16 %v58_v36, %v51_v62 }
 0xfcd   :  { %946 = vrot.lane.b32.xlu1 %v944_v38, %s4031_s21  ;;  %v50_v38 = vld [vmem:[%s5057_s2 + $0x80] sm:$0xff] }
0x103f   :  { %v947_v40 = vpop.permute.xlu1 %946 }
0x1040   :  { %v949_v41 = vadd.f32 %v947_v40, %v939_v39  ;;  %v57_v39 = vld [vmem:[%s5057_s2 + $0xb8] sm:$0xff] }
0x1041   :  { %v4440_v40 = vpack.c.bf16 %v57_v39, %v50_v38 }
0x1042   :  { %3970 = vtanh.f32 %v949_v41 }
0x104c   :  { %v3971_v43 = vpop.eup %3970 }
0x104d   :  { %952 = vrot.lane.b32.xlu0 %v3971_v43, %s4031_s21  ;;  %v72_v43 = vld [vmem:[%s5057_s2 + $0x130] sm:$0xff] }
0x10bf   :  { %v953_v45 = vpop.permute.xlu0 %952 }
0x10c0   :  { %v955_v46 = vmul.f32 %v953_v45, %v938_v52  ;;  %v36_v52 = vld [vmem:[%s5057_s2 + $0x10] sm:$0xff] }
0x10c1   :  { %v4421_v59 = vpack.c.bf16 %v43_v53, %v36_v52  ;;  %v45_v52 = vld [vmem:[%s5057_s2 + $0x58] sm:$0xff] }
0x10c2   :  { %3170 = vmatmul.mubr.msk.f32.vlgmr.msra.gmra.mrb[14].mxu0 %vm90_vm2, %v955_v46  ;;  %v64_v46 = vld [vmem:[%s5057_s2 + $0xf0] sm:$0xff]  ;;  %v53_v53 = vld [vmem:[%s5057_s2 + $0x98] sm:$0xff] }
0x10c3   :  { %1882 = vmatprep.mubr.f32.mxu0 %v4029_v4  ;;  %3657 = vmatpush1.bf16.msra.mxu0 %v4421_v59 }
0x10c4   :  { %3659 = vmatprep.subr.bf16.mxu0 %v4432_v37 }
0x10c7   :  { %3661 = vmatpush1.bf16.msra.mxu0 %v4440_v40 }
0x1195   :  { %v1025_v47 = vpop.f32.mrb[14].mxu0 }
0x1196   :  { %v1027_v49 = vpop.f32.mrb[15].mxu0  ;;  %v3898_v57 = vadd.f32 %v1025_v47, %v4121_v27  ;;  %v34_v27 = vld [vmem:[%s5057_s2] sm:$0xff]  ;;  %v71_v47 = vld [vmem:[%s5057_s2 + $0x128] sm:$0xff] }
0x1197   :  { %v3899_v50 = vadd.f32 %v1027_v49, %v4086_v13  ;;  %v3536_v12 = vpack.c.bf16 %v41_v9, %v34_v27  ;;  %v4458_v49 = vpack.c.bf16 %v71_v47, %v64_v46  ;;  %v67_v46 = vld [vmem:[%s5057_s2 + $0x108] sm:$0xff]  ;;  %v74_v47 = vld [vmem:[%s5057_s2 + $0x140] sm:$0xff] }
0x1198   :  { %v1032_v60 = vmul.f32 0.5, %v3898_v57  ;;  %v78_v57 = vld [vmem:[%s5057_s2 + $0x160] sm:$0xff] }
0x1199   :  { %v1033_v51 = vmul.f32 %v3899_v50, %v4088_v14  ;;  %3537 = vmatpush1.bf16.msra.mxu1 %v3536_v12  ;;  %v79_v50 = vld [vmem:[%s5057_s2 + $0x168] sm:$0xff] }
0x119a   :  { %3539 = vmatprep.subr.bf16.mxu1 %v3538_v15 }
0x119b   :  { %3972 = vtanh.f32 %v1033_v51  ;;  %v86_v51 = vld [vmem:[%s5057_s2 + $0x1a0] sm:$0xff] }
0x119c   :  { %3974 = vtanh.f32 %v1032_v60  ;;  %v85_v60 = vld [vmem:[%s5057_s2 + $0x198] sm:$0xff] }
0x119d   :  { %3541 = vmatpush1.bf16.msra.mxu1 %v3540_v42 }
0x119e   :  { %3543 = vmatprep.subr.bf16.mxu1 %v3542_v21 }
0x11a1   :  { %3545 = vmatpush1.bf16.msra.mxu1 %v3544_v26 }
0x11a2   :  { %3547 = vmatprep.subr.bf16.mxu1 %v3546_v29  ;;  %v39_v29 = vld [vmem:[%s5057_s2 + $0x28] sm:$0xff] }
0x11a5   :  { %v3973_v54 = vpop.eup %3972  ;;  %3549 = vmatpush1.bf16.msra.mxu1 %v3548_v32  ;;  %v4529_v32 = vpack.c.bf16 %v46_v30, %v39_v29 }
0x11a6   :  { %v1037_v55 = vmul.f32 %v3973_v54, %v4088_v14  ;;  %v3975_v61 = vpop.eup %3974  ;;  %3551 = vmatprep.subr.bf16.mxu1 %v4413_v48 }
0x11a7   :  { %v1036_v63 = vmul.f32 0.5, %v3975_v61  ;;  %v4477_v61 = vpack.c.bf16 %v85_v60, %v78_v57  ;;  %v73_v57 = vld [vmem:[%s5057_s2 + $0x138] sm:$0xff] }
0x11a8   :  { %v4353_v56 = vadd.f32 %v1037_v55, %v4094_v20  ;;  %v4468_v55 = vpack.c.bf16 %v86_v51, %v79_v50  ;;  %v4571_v51 = vpack.c.bf16 %v74_v47, %v67_v46  ;;  %v81_v60 = vld [vmem:[%s5057_s2 + $0x178] sm:$0xff] }
0x11a9   :  { %v1038_v0 = vadd.f32 0.5, %v1036_v63 }
0x11aa   :  { %1042 = vrot.lane.b32.xlu1 %v4353_v56, %s4031_s21 }
0x11ab   :  { %v1040_v33 = vmul.f32 %v1038_v0, %v949_v41  ;;  %v65_v41 = vld [vmem:[%s5057_s2 + $0xf8] sm:$0xff] }
0x11ac   :  { %v4450_v45 = vpack.c.bf16 %v72_v43, %v65_v41  ;;  %v52_v41 = vld [vmem:[%s5057_s2 + $0x90] sm:$0xff]  ;;  %v59_v43 = vld [vmem:[%s5057_s2 + $0xc8] sm:$0xff] }
0x11ad   :  { %v4567_v50 = vpack.c.bf16 %v59_v43, %v52_v41 }
0x11ae   :  { %3663 = vmatprep.subr.bf16.mxu0 %v4450_v45 }
0x11af   :  { %3665 = vmatpush1.bf16.msra.mxu0 %v4458_v49 }
0x11b0   :  { %3667 = vmatprep.subr.bf16.mxu0 %v4468_v55 }
0x11b3   :  { %3669 = vmatpush1.bf16.msra.mxu0 %v4477_v61 }
0x11b4   :  { %3686 = vmatprep.subr.bf16.mxu0 %v4032_v44 }
0x121c   :  { %v1043_v13 = vpop.permute.xlu1 %1042 }
0x121d   :  { %v1045_v1 = vmul.f32 %v1043_v13, %v1038_v0  ;;  %v1202_v13 = vrot.slane %v4072_v3, 6 }
0x121f   :  { %1047 = vrot.lane.b32.xlu0 %v1045_v1, %s4031_s21  ;;  %v1281_v1 = vsub.s32 5, %v4080_v8 }
0x1221   :  { %v1282_v27 = vrot.slane %v4072_v3, %v1281_v1  ;;  %v1286_v7 = vrot.slane %v4065_v2, %v1281_v1  ;;  %v87_v1 = vld [vmem:[%s5057_s2 + $0x1a8] sm:$0xff] }
0x1291   :  { %v1048_v35 = vpop.permute.xlu0 %1047 }
0x1292   :  { %v1050_v58 = vadd.f32 %v1048_v35, %v1040_v33  ;;  %v38_v35 = vld [vmem:[%s5057_s2 + $0x20] sm:$0xff] }
0x1293   :  { %v4549_v36 = vpack.c.bf16 %v45_v52, %v38_v35  ;;  %v106_v35 = vsub.s32 3, %v4080_v8  ;;  %v4027_v52 = vld [vmem:[%s5056_s1] sm:$0xff] }
0x1294   :  { %3976 = vtanh.f32 %v1050_v58  ;;  %v60_v58 = vld [vmem:[%s5057_s2 + $0xd0] sm:$0xff] }
0x1295   :  { %v4551_v39 = vpack.c.bf16 %v60_v58, %v53_v53  ;;  %v4672_v53 = vrot.slane %v4027_v52, %v106_v35 }
0x129e   :  { %v3977_v54 = vpop.eup %3976 }
0x129f   :  { %1053 = vrot.lane.b32.xlu1 %v3977_v54, %s4031_s21  ;;  %v66_v54 = vld [vmem:[%s5057_s2 + $0x100] sm:$0xff] }
0x1311   :  { %v1054_v63 = vpop.permute.xlu1 %1053 }
0x1312   :  { %v1056_v0 = vmul.f32 %v1054_v63, %v4353_v56  ;;  %v1203_v56 = vrot.slane %v4065_v2, 6  ;;  %v88_v63 = vld [vmem:[%s5057_s2 + $0x1b0] sm:$0xff] }
0x1314   :  { %1299 = vrot.lane.b32.xlu1 %v1056_v0, %s4031_s21  ;;  %3171 = vmatmul.mubr.msk.f32.vlgmr.msra.gmra.mrb[0].mxu1 %vm90_vm2, %v1056_v0 }
0x1315   :  { %3553 = vmatpush1.bf16.msra.mxu1 %v4421_v59  ;;  %1195 = vmatprep.mubr.f32.mxu1 %v4029_v4 }
0x1316   :  { %3555 = vmatprep.subr.bf16.mxu1 %v4432_v37 }
0x1319   :  { %3557 = vmatpush1.bf16.msra.mxu1 %v4440_v40 }
0x131a   :  { %3559 = vmatprep.subr.bf16.mxu1 %v4450_v45 }
0x131d   :  { %3561 = vmatpush1.bf16.msra.mxu1 %v4458_v49 }
0x131e   :  { %3563 = vmatprep.subr.bf16.mxu1 %v4468_v55 }
0x1321   :  { %3565 = vmatpush1.bf16.msra.mxu1 %v4477_v61 }
0x1322   :  { %3173 = vmatprep.subr.msk.mxu1 %vm205_vm0, %v1203_v56  ;;  %v4589_v56 = vpack.c.bf16 %v88_v63, %v81_v60 }
0x1324   :  { %3172 = vmatmul.mubr.msk.f32.vlgmr.msra.gmra.mrb[2].mxu1 %vm90_vm2, %v1056_v0  ;;  %v4586_v0 = vpack.c.bf16 %v73_v57, %v66_v54 }
0x1325   :  { %3174 = vmatpush1.msk.msra.mxu1 %vm205_vm0, %v1202_v13  ;;  %1272 = vmatprep.mubr.f32.mxu1 %v4029_v4  ;;  %v80_v13 = vld [vmem:[%s5057_s2 + $0x170] sm:$0xff] }
0x1326   :  { %3567 = vmatprep.subr.bf16.mxu1 %v4413_v48 }
0x1328   :  { %3175 = vmatmul.mubr.msk.f32.vlgmr.msra.gmra.mrb[0].mxu1 %vm180_vm1, %v4233_v24 }
0x1329   :  { %3569 = vmatpush1.bf16.msra.mxu1 %v4421_v59  ;;  %1386 = vmatprep.mubr.f32.mxu1 %v4029_v4 }
0x132a   :  { %3571 = vmatprep.subr.bf16.mxu1 %v4432_v37 }
0x132d   :  { %3573 = vmatpush1.bf16.msra.mxu1 %v4440_v40 }
0x132e   :  { %3575 = vmatprep.subr.bf16.mxu1 %v4450_v45 }
0x1331   :  { %3577 = vmatpush1.bf16.msra.mxu1 %v4458_v49 }
0x1332   :  { %3579 = vmatprep.subr.bf16.mxu1 %v4468_v55 }
0x1335   :  { %3581 = vmatpush1.bf16.msra.mxu1 %v4477_v61 }
0x1336   :  { %3583 = vmatprep.subr.bf16.mxu1 %v4529_v32 }
0x1386   :  { %v1300_v23 = vpop.permute.xlu1 %1299 }
0x13f7   :  { %v1197_v5 = vpop.f32.mrb[2].mxu1 }
0x13f8   :  { %v1199_v6 = vpop.f32.mrb[3].mxu1 }
0x13fb   :  { %v1274_v9 = vpop.f32.mrb[0].mxu1 }
0x13fc   :  { %v4512_v10 = vadd.f32 %v1282_v27, %v1274_v9  ;;  %v1276_v11 = vpop.f32.mrb[1].mxu1  ;;  %v47_v27 = vld [vmem:[%s5057_s2 + $0x68] sm:$0xff]  ;;  %v54_v9 = vld [vmem:[%s5057_s2 + $0xa0] sm:$0xff] }
0x13fd   :  { %v4514_v12 = vadd.f32 %v1286_v7, %v1276_v11  ;;  %v61_v11 = vld [vmem:[%s5057_s2 + $0xd8] sm:$0xff] }
0x13fe   :  { %v1289_v2 = vadd.f32 %v4512_v10, %v1197_v5  ;;  %v4598_v5 = vpack.c.bf16 %v87_v1, %v80_v13 }
0x13ff   :  { %v1290_v15 = vadd.f32 %v4514_v12, %v1199_v6  ;;  %v40_v6 = vld [vmem:[%s5057_s2 + $0x30] sm:$0xff] }
0x1400   :  { %v1291_v3 = vmul.f32 0.5, %v1289_v2  ;;  %v4608_v7 = vpack.c.bf16 %v47_v27, %v40_v6  ;;  %v89_v2 = vld [vmem:[%s5057_s2 + $0x1b8] sm:$0xff] }
0x1401   :  { %v1292_v16 = vmul.f32 %v1290_v15, %v4088_v14  ;;  %v4619_v15 = vpack.c.bf16 %v61_v11, %v54_v9 }
0x1403   :  { %3978 = vtanh.f32 %v1292_v16  ;;  %v68_v16 = vld [vmem:[%s5057_s2 + $0x110] sm:$0xff] }
0x1404   :  { %3980 = vtanh.f32 %v1291_v3 }
0x140d   :  { %v3979_v17 = vpop.eup %3978 }
0x140e   :  { %v1296_v18 = vmul.f32 %v3979_v17, %v4088_v14  ;;  %v3981_v42 = vpop.eup %3980  ;;  %v75_v17 = vld [vmem:[%s5057_s2 + $0x148] sm:$0xff] }
0x140f   :  { %v1295_v21 = vmul.f32 0.5, %v3981_v42 }
0x1410   :  { %v1298_v19 = vadd.f32 %v1296_v18, %v4094_v20  ;;  %v4631_v18 = vpack.c.bf16 %v75_v17, %v68_v16 }
0x1411   :  { %v1297_v22 = vadd.f32 0.5, %v1295_v21 }
0x1412   :  { %1304 = vrot.lane.b32.xlu0 %v1298_v19, %s4031_s21 }
0x1413   :  { %v1302_v26 = vmul.f32 %v1300_v23, %v1297_v22 }
0x1484   :  { %v1305_v25 = vpop.permute.xlu0 %1304 }
0x1485   :  { %v1307_v28 = vmul.f32 %v1305_v25, %v1297_v22  ;;  %v110_v22 = vsub.s32 4, %v4080_v8  ;;  %v4026_v25 = vld [vmem:[%s5056_s1 + $0x8] sm:$0xff] }
0x1487   :  { %1309 = vrot.lane.b32.xlu0 %v1307_v28, %s4031_s21  ;;  %v4660_v28 = vrot.slane %v4026_v25, %v110_v22 }
0x14f9   :  { %v1310_v31 = vpop.permute.xlu0 %1309 }
0x14fa   :  { %v4531_v33 = vadd.f32 %v1310_v31, %v1302_v26 }
0x14fc   :  { %3982 = vtanh.f32 %v4531_v33 }
0x1506   :  { %v3983_v34 = vpop.eup %3982 }
0x1507   :  { %1315 = vrot.lane.b32.xlu1 %v3983_v34, %s4031_s21 }
0x1579   :  { %v1316_v62 = vpop.permute.xlu1 %1315 }
0x157a   :  { %v1318_v38 = vmul.f32 %v1316_v62, %v1298_v19  ;;  %v82_v19 = vld [vmem:[%s5057_s2 + $0x180] sm:$0xff] }
0x157b   :  { %v4641_v3 = vpack.c.bf16 %v89_v2, %v82_v19 }
0x157c   :  { %3176 = vmatmul.mubr.msk.f32.vlgmr.msra.gmra.mrb[4].mxu1 %vm90_vm2, %v1318_v38 }
0x157d   :  { %3585 = vmatpush1.bf16.msra.mxu1 %v4549_v36  ;;  %1457 = vmatprep.mubr.f32.mxu1 %v4029_v4 }
0x157e   :  { %3587 = vmatprep.subr.bf16.mxu1 %v4551_v39 }
0x1581   :  { %3589 = vmatpush1.bf16.msra.mxu1 %v4567_v50 }
0x1582   :  { %3591 = vmatprep.subr.bf16.mxu1 %v4571_v51 }
0x1585   :  { %3593 = vmatpush1.bf16.msra.mxu1 %v4586_v0 }
0x1586   :  { %3595 = vmatprep.subr.bf16.mxu1 %v4589_v56 }
0x1589   :  { %3597 = vmatpush1.bf16.msra.mxu1 %v4598_v5 }
0x158a   :  { %3598 = vmatprep.subr.bf16.mxu1 %v4032_v44 }
0x158c   :  { %3177 = vmatmul.mubr.msk.f32.vlgmr.msra.gmra.mrb[6].mxu1 %vm90_vm2, %v1318_v38 }
0x158d   :  { %3600 = vmatpush3.bf16.msra.mxu1 %v4608_v7  ;;  %3286 = vmatprep.mubr.msk.f32.mxu1 %vm4033_vm3, %v4029_v4 }
0x158e   :  { %3601 = vmatprep.subr.bf16.mxu1 %v4032_v44 }
0x1591   :  { %3603 = vmatpush3.bf16.msra.mxu1 %v4619_v15 }
0x1592   :  { %3604 = vmatprep.subr.bf16.mxu1 %v4032_v44 }
0x1595   :  { %3606 = vmatpush3.bf16.msra.mxu1 %v4631_v18 }
0x1596   :  { %3607 = vmatprep.subr.bf16.mxu1 %v4032_v44 }
0x1599   :  { %3609 = vmatpush3.bf16.msra.mxu1 %v4641_v3 }
0x159a   :  { %3611 = vmatprep.subr.bf16.mxu1 %v4413_v48 }
0x159c   :  { %3287 = vmatmul.mubr.msk.f32.vlgmr.msra.gmra.mrb[8].mxu1 %vm90_vm2, %v1318_v38 }
0x159d   :  { %3613 = vmatpush1.bf16.msra.mxu1 %v4421_v59  ;;  %1634 = vmatprep.mubr.f32.mxu1 %v4029_v4 }
0x159e   :  { %3615 = vmatprep.subr.bf16.mxu1 %v4432_v37 }
0x15a1   :  { %3617 = vmatpush1.bf16.msra.mxu1 %v4440_v40 }
0x15a2   :  { %3619 = vmatprep.subr.bf16.mxu1 %v4450_v45 }
0x15a5   :  { %3621 = vmatpush1.bf16.msra.mxu1 %v4458_v49 }
0x15a6   :  { %3623 = vmatprep.subr.bf16.mxu1 %v4468_v55 }
0x15a9   :  { %3625 = vmatpush1.bf16.msra.mxu1 %v4477_v61 }
0x15aa   :  { %3627 = vmatprep.subr.bf16.mxu1 %v4529_v32 }
0x164f   :  { %v1388_v42 = vpop.f32.mrb[4].mxu1 }
0x1650   :  { %v1390_v21 = vpop.f32.mrb[5].mxu1 }
0x165f   :  { %v1459_v23 = vpop.f32.mrb[6].mxu1 }
0x1660   :  { %v1461_v26 = vpop.f32.mrb[7].mxu1  ;;  %v1536_v46 = vadd.f32 %v1459_v23, %v4512_v10 }
0x1661   :  { %v1537_v29 = vadd.f32 %v1461_v26, %v4514_v12 }
0x1663   :  { %v4664_v30 = vadd.f32 %v1537_v29, %v4660_v28 }
0x1665   :  { %v1541_v31 = vadd.f32 %v4664_v30, %v1390_v21 }
0x1667   :  { %v1543_v34 = vmul.f32 %v1541_v31, %v4088_v14 }
0x1669   :  { %3984 = vtanh.f32 %v1543_v34 }
0x166f   :  { %v1530_v58 = vpop.f32.mrb[8].mxu1 }
0x1670   :  { %v1534_v62 = vadd.f32 %v1530_v58, %v4672_v53  ;;  %v3288_v12 = vpop.f32.mrb[9].mxu1 }
0x1672   :  { %v4676_v38 = vadd.f32 %v1534_v62, %v4233_v24  ;;  %3138 = vst.msk [vmem:[%s5058_s4] sm:$0xff] %vm180_vm1, %v1534_v62  ;;  %v4690_v24 = vrot.slane %v4027_v52, %v110_v22 }
0x1673   :  { %v3985_v8 = vpop.eup %3984 }
0x1674   :  { %3130 = vst.msk [vmem:[%s5059_s3] sm:$0xff] %vm180_vm1, %v4676_v38  ;;  %v1547_v41 = vmul.f32 %v3985_v8, %v4088_v14  ;;  %v4694_v47 = vadd.f32 %v1536_v46, %v4690_v24 }
0x1676   :  { %v1549_v43 = vadd.f32 %v1547_v41, %v4094_v20  ;;  %v1540_v54 = vadd.f32 %v4694_v47, %v1388_v42 }
0x1678   :  { %1552 = vrot.lane.b32.xlu0 %v1549_v43, %s4031_s21  ;;  %v1542_v57 = vmul.f32 0.5, %v1540_v54 }
0x167a   :  { %3986 = vtanh.f32 %v1542_v57 }
0x1684   :  { %v3987_v60 = vpop.eup %3986 }
0x1685   :  { %v1546_v63 = vmul.f32 0.5, %v3987_v60 }
0x1687   :  { %v1548_v13 = vadd.f32 0.5, %v1546_v63 }
0x1689   :  { %v1550_v27 = vmul.f32 %v1548_v13, %v4531_v33 }
0x16ea   :  { %v1553_v1 = vpop.permute.xlu0 %1552 }
0x16eb   :  { %v1555_v6 = vmul.f32 %v1553_v1, %v1548_v13 }
0x16ed   :  { %1557 = vrot.lane.b32.xlu1 %v1555_v6, %s4031_s21 }
0x175f   :  { %v1558_v9 = vpop.permute.xlu1 %1557 }
0x1760   :  { %v4699_v11 = vadd.f32 %v1558_v9, %v1550_v27 }
0x1762   :  { %3988 = vtanh.f32 %v4699_v11 }
0x176c   :  { %v3989_v10 = vpop.eup %3988 }
0x176d   :  { %1563 = vrot.lane.b32.xlu0 %v3989_v10, %s4031_s21 }
0x17df   :  { %v1564_v16 = vpop.permute.xlu0 %1563 }
0x17e0   :  { %v1566_v17 = vmul.f32 %v1564_v16, %v1549_v43 }
0x17e2   :  { %3179 = vmatmul.mubr.msk.f32.vlgmr.msra.gmra.mrb[10].mxu1 %vm90_vm2, %v1566_v17 }
0x17e3   :  { %3629 = vmatpush1.bf16.msra.mxu1 %v4549_v36  ;;  %1705 = vmatprep.mubr.f32.mxu1 %v4029_v4 }
0x17e4   :  { %3631 = vmatprep.subr.bf16.mxu1 %v4551_v39 }
0x17e7   :  { %3633 = vmatpush1.bf16.msra.mxu1 %v4567_v50 }
0x17e8   :  { %3635 = vmatprep.subr.bf16.mxu1 %v4571_v51 }
0x17eb   :  { %3637 = vmatpush1.bf16.msra.mxu1 %v4586_v0 }
0x17ec   :  { %3639 = vmatprep.subr.bf16.mxu1 %v4589_v56 }
0x17ef   :  { %3641 = vmatpush1.bf16.msra.mxu1 %v4598_v5 }
0x17f0   :  { %3642 = vmatprep.subr.bf16.mxu1 %v4032_v44 }
0x17f2   :  { %3180 = vmatmul.mubr.msk.f32.vlgmr.msra.gmra.mrb[12].mxu1 %vm90_vm2, %v1566_v17 }
0x17f3   :  { %3644 = vmatpush3.bf16.msra.mxu1 %v4608_v7  ;;  %3305 = vmatprep.mubr.msk.f32.mxu1 %vm4033_vm3, %v4029_v4 }
0x17f4   :  { %3645 = vmatprep.subr.bf16.mxu1 %v4032_v44 }
0x17f7   :  { %3647 = vmatpush3.bf16.msra.mxu1 %v4619_v15 }
0x17f8   :  { %3648 = vmatprep.subr.bf16.mxu1 %v4032_v44 }
0x17fb   :  { %3650 = vmatpush3.bf16.msra.mxu1 %v4631_v18 }
0x17fc   :  { %3651 = vmatprep.subr.bf16.mxu1 %v4032_v44 }
0x17ff   :  { %3653 = vmatpush3.bf16.msra.mxu1 %v4641_v3 }
0x1800   :  { %3671 = vmatprep.subr.bf16.mxu1 %v4529_v32 }
0x1802   :  { %3306 = vmatmul.mubr.msk.f32.vlgmr.msra.gmra.mrb[14].mxu1 %vm90_vm2, %v1566_v17 }
0x1803   :  { %3673 = vmatpush1.bf16.msra.mxu1 %v4549_v36  ;;  %1953 = vmatprep.mubr.f32.mxu1 %v4029_v4 }
0x1804   :  { %3675 = vmatprep.subr.bf16.mxu1 %v4551_v39 }
0x1807   :  { %3677 = vmatpush1.bf16.msra.mxu1 %v4567_v50 }
0x1808   :  { %3679 = vmatprep.subr.bf16.mxu1 %v4571_v51 }
0x180b   :  { %3681 = vmatpush1.bf16.msra.mxu1 %v4586_v0 }
0x180c   :  { %3683 = vmatprep.subr.bf16.mxu1 %v4589_v56 }
0x180f   :  { %3685 = vmatpush1.bf16.msra.mxu1 %v4598_v5 }
0x1810   :  { %3699 = vmatprep.subr.bf16.mxu1 %v4413_v48 }
0x18b5   :  { %v1636_v33 = vpop.f32.mrb[10].mxu1 }
0x18b6   :  { %v1638_v19 = vpop.f32.mrb[11].mxu1 }
0x18c5   :  { %v1707_v2 = vpop.f32.mrb[12].mxu1 }
0x18c6   :  { %v1709_v42 = vpop.f32.mrb[13].mxu1  ;;  %v1784_v58 = vadd.f32 %v1707_v2, %v4694_v47 }
0x18c7   :  { %v1785_v21 = vadd.f32 %v1709_v42, %v4664_v30 }
0x18c8   :  { %v4758_v62 = vadd.f32 %v1784_v58, %v4690_v24 }
0x18c9   :  { %v4736_v22 = vadd.f32 %v1785_v21, %v4660_v28 }
0x18ca   :  { %v1788_v12 = vadd.f32 %v4758_v62, %v1636_v33 }
0x18cb   :  { %v1789_v25 = vadd.f32 %v4736_v22, %v1638_v19 }
0x18cd   :  { %v1791_v23 = vmul.f32 %v1789_v25, %v4088_v14 }
0x18cf   :  { %3990 = vtanh.f32 %v1791_v23 }
0x18d5   :  { %v1778_v26 = vpop.f32.mrb[14].mxu1 }
0x18d6   :  { %v1782_v29 = vadd.f32 %v1778_v26, %v4672_v53  ;;  %v3307_v31 = vpop.f32.mrb[15].mxu1 }
0x18d8   :  { %v4742_v34 = vadd.f32 %v1782_v29, %v4676_v38  ;;  %3139 = vst.msk [vmem:[%s5058_s4 + $0x8] sm:$0xff] %vm180_vm1, %v1782_v29  ;;  %v1790_v38 = vmul.f32 0.5, %v1788_v12 }
0x18d9   :  { %v3991_v30 = vpop.eup %3990 }
0x18da   :  { %3131 = vst.msk [vmem:[%s5059_s3 + $0x8] sm:$0xff] %vm180_vm1, %v4742_v34  ;;  %v1795_v35 = vmul.f32 %v3991_v30, %v4088_v14  ;;  %3992 = vtanh.f32 %v1790_v38 }
0x18dc   :  { %v1797_v52 = vadd.f32 %v1795_v35, %v4094_v20 }
0x18de   :  { %1800 = vrot.lane.b32.xlu1 %v1797_v52, %s4031_s21 }
0x18e4   :  { %v3993_v8 = vpop.eup %3992 }
0x18e5   :  { %v1794_v41 = vmul.f32 0.5, %v3993_v8 }
0x18e7   :  { %v1796_v43 = vadd.f32 0.5, %v1794_v41 }
0x18e9   :  { %v1798_v57 = vmul.f32 %v1796_v43, %v4699_v11 }
0x1950   :  { %v1801_v46 = vpop.permute.xlu1 %1800 }
0x1951   :  { %v1803_v54 = vmul.f32 %v1801_v46, %v1796_v43 }
0x1953   :  { %1805 = vrot.lane.b32.xlu0 %v1803_v54, %s4031_s21 }
0x19c5   :  { %v1806_v60 = vpop.permute.xlu0 %1805 }
0x19c6   :  { %v4763_v63 = vadd.f32 %v1806_v60, %v1798_v57 }
0x19c8   :  { %3994 = vtanh.f32 %v4763_v63 }
0x19d2   :  { %v3995_v47 = vpop.eup %3994 }
0x19d3   :  { %1811 = vrot.lane.b32.xlu1 %v3995_v47, %s4031_s21 }
0x1a45   :  { %v1812_v13 = vpop.permute.xlu1 %1811 }
0x1a46   :  { %v1814_v1 = vmul.f32 %v1812_v13, %v1797_v52 }
0x1a48   :  { %3182 = vmatmul.mubr.msk.f32.vlgmr.msra.gmra.mrb[16].mxu0 %vm90_vm2, %v1814_v1  ;;  %3183 = vmatmul.mubr.msk.f32.vlgmr.msra.gmra.mrb[16].mxu1 %vm90_vm2, %v1814_v1 }
0x1a49   :  { %3688 = vmatpush3.bf16.msra.mxu0 %v4608_v7  ;;  %3324 = vmatprep.mubr.msk.f32.mxu0 %vm4033_vm3, %v4029_v4 }
0x1a4a   :  { %3689 = vmatprep.subr.bf16.mxu0 %v4032_v44  ;;  %3701 = vmatpush1.bf16.msra.mxu1 %v4421_v59 }
0x1a4b   :  { %3703 = vmatprep.subr.bf16.mxu1 %v4432_v37  ;;  %2130 = vmatprep.mubr.f32.mxu1 %v4029_v4 }
0x1a4d   :  { %3691 = vmatpush3.bf16.msra.mxu0 %v4619_v15 }
0x1a4e   :  { %3692 = vmatprep.subr.bf16.mxu0 %v4032_v44  ;;  %3705 = vmatpush1.bf16.msra.mxu1 %v4440_v40 }
0x1a4f   :  { %3707 = vmatprep.subr.bf16.mxu1 %v4450_v45 }
0x1a51   :  { %3694 = vmatpush3.bf16.msra.mxu0 %v4631_v18 }
0x1a52   :  { %3695 = vmatprep.subr.bf16.mxu0 %v4032_v44  ;;  %3709 = vmatpush1.bf16.msra.mxu1 %v4458_v49 }
0x1a53   :  { %3711 = vmatprep.subr.bf16.mxu1 %v4468_v55 }
0x1a55   :  { %3697 = vmatpush3.bf16.msra.mxu0 %v4641_v3 }
0x1a56   :  { %3715 = vmatprep.subr.bf16.mxu0 %v4529_v32  ;;  %3713 = vmatpush1.bf16.msra.mxu1 %v4477_v61 }
0x1a57   :  { %3730 = vmatprep.subr.bf16.mxu1 %v4032_v44 }
0x1a58   :  { %3325 = vmatmul.mubr.msk.f32.vlgmr.msra.gmra.mrb[18].mxu0 %vm90_vm2, %v1814_v1 }
0x1a59   :  { %3717 = vmatpush1.bf16.msra.mxu0 %v4549_v36  ;;  %2201 = vmatprep.mubr.f32.mxu0 %v4029_v4 }
0x1a5a   :  { %3719 = vmatprep.subr.bf16.mxu0 %v4551_v39 }
0x1a5d   :  { %3721 = vmatpush1.bf16.msra.mxu0 %v4567_v50 }
0x1a5e   :  { %3723 = vmatprep.subr.bf16.mxu0 %v4571_v51 }
0x1a61   :  { %3725 = vmatpush1.bf16.msra.mxu0 %v4586_v0 }
0x1a62   :  { %3727 = vmatprep.subr.bf16.mxu0 %v4589_v56 }
0x1a65   :  { %3729 = vmatpush1.bf16.msra.mxu0 %v4598_v5 }
0x1a66   :  { %3743 = vmatprep.subr.bf16.mxu0 %v4413_v48 }
0x1b1b   :  { %v1884_v6 = vpop.f32.mrb[16].mxu0  ;;  %v1955_v27 = vpop.f32.mrb[16].mxu1 }
0x1b1c   :  { %v1886_v9 = vpop.f32.mrb[17].mxu0  ;;  %v1957_v11 = vpop.f32.mrb[17].mxu1  ;;  %v2032_v26 = vadd.f32 %v1955_v27, %v4758_v62 }
0x1b1d   :  { %v2033_v10 = vadd.f32 %v1957_v11, %v4736_v22 }
0x1b1e   :  { %v4822_v29 = vadd.f32 %v2032_v26, %v4690_v24 }
0x1b1f   :  { %v4800_v16 = vadd.f32 %v2033_v10, %v4660_v28 }
0x1b20   :  { %v2036_v31 = vadd.f32 %v4822_v29, %v1884_v6 }
0x1b21   :  { %v2037_v17 = vadd.f32 %v4800_v16, %v1886_v9 }
0x1b23   :  { %v2039_v33 = vmul.f32 %v2037_v17, %v4088_v14 }
0x1b25   :  { %3996 = vtanh.f32 %v2039_v33 }
0x1b2b   :  { %v2026_v19 = vpop.f32.mrb[18].mxu0 }
0x1b2c   :  { %v2030_v2 = vadd.f32 %v2026_v19, %v4672_v53  ;;  %v3326_v42 = vpop.f32.mrb[19].mxu0 }
0x1b2e   :  { %v4806_v21 = vadd.f32 %v2030_v2, %v4742_v34  ;;  %3140 = vst.msk [vmem:[%s5058_s4 + $0x10] sm:$0xff] %vm180_vm1, %v2030_v2  ;;  %v2038_v34 = vmul.f32 0.5, %v2036_v31 }
0x1b2f   :  { %v3997_v22 = vpop.eup %3996 }
0x1b30   :  { %3132 = vst.msk [vmem:[%s5059_s3 + $0x10] sm:$0xff] %vm180_vm1, %v4806_v21  ;;  %v2043_v25 = vmul.f32 %v3997_v22, %v4088_v14  ;;  %3998 = vtanh.f32 %v2038_v34 }
0x1b32   :  { %v2045_v23 = vadd.f32 %v2043_v25, %v4094_v20 }
0x1b34   :  { %2048 = vrot.lane.b32.xlu0 %v2045_v23, %s4031_s21 }
0x1b3a   :  { %v3999_v30 = vpop.eup %3998 }
0x1b3b   :  { %v2042_v35 = vmul.f32 0.5, %v3999_v30 }
0x1b3d   :  { %v2044_v52 = vadd.f32 0.5, %v2042_v35 }
0x1b3f   :  { %v2046_v38 = vmul.f32 %v2044_v52, %v4763_v63 }
0x1ba6   :  { %v2049_v58 = vpop.permute.xlu0 %2048 }
0x1ba7   :  { %v2051_v12 = vmul.f32 %v2049_v58, %v2044_v52 }
0x1ba9   :  { %2053 = vrot.lane.b32.xlu1 %v2051_v12, %s4031_s21 }
0x1c1b   :  { %v2054_v8 = vpop.permute.xlu1 %2053 }
0x1c1c   :  { %v4827_v41 = vadd.f32 %v2054_v8, %v2046_v38 }
0x1c1e   :  { %4000 = vtanh.f32 %v4827_v41 }
0x1c28   :  { %v4001_v62 = vpop.eup %4000 }
0x1c29   :  { %2059 = vrot.lane.b32.xlu0 %v4001_v62, %s4031_s21 }
0x1c9b   :  { %v2060_v43 = vpop.permute.xlu0 %2059 }
0x1c9c   :  { %v2062_v46 = vmul.f32 %v2060_v43, %v2045_v23 }
0x1c9e   :  { %3185 = vmatmul.mubr.msk.f32.vlgmr.msra.gmra.mrb[18].mxu1 %vm90_vm2, %v2062_v46  ;;  %3186 = vmatmul.mubr.msk.f32.vlgmr.msra.gmra.mrb[20].mxu0 %vm90_vm2, %v2062_v46 }
0x1c9f   :  { %3732 = vmatpush3.bf16.msra.mxu1 %v4608_v7  ;;  %3343 = vmatprep.mubr.msk.f32.mxu1 %vm4033_vm3, %v4029_v4 }
0x1ca0   :  { %3733 = vmatprep.subr.bf16.mxu1 %v4032_v44  ;;  %3745 = vmatpush1.bf16.msra.mxu0 %v4421_v59 }
0x1ca1   :  { %3747 = vmatprep.subr.bf16.mxu0 %v4432_v37  ;;  %2378 = vmatprep.mubr.f32.mxu0 %v4029_v4 }
0x1ca3   :  { %3735 = vmatpush3.bf16.msra.mxu1 %v4619_v15 }
0x1ca4   :  { %3736 = vmatprep.subr.bf16.mxu1 %v4032_v44  ;;  %3749 = vmatpush1.bf16.msra.mxu0 %v4440_v40 }
0x1ca5   :  { %3751 = vmatprep.subr.bf16.mxu0 %v4450_v45 }
0x1ca7   :  { %3738 = vmatpush3.bf16.msra.mxu1 %v4631_v18 }
0x1ca8   :  { %3739 = vmatprep.subr.bf16.mxu1 %v4032_v44  ;;  %3753 = vmatpush1.bf16.msra.mxu0 %v4458_v49 }
0x1ca9   :  { %3755 = vmatprep.subr.bf16.mxu0 %v4468_v55 }
0x1cab   :  { %3741 = vmatpush3.bf16.msra.mxu1 %v4641_v3 }
0x1cac   :  { %3759 = vmatprep.subr.bf16.mxu1 %v4529_v32  ;;  %3757 = vmatpush1.bf16.msra.mxu0 %v4477_v61 }
0x1cad   :  { %3774 = vmatprep.subr.bf16.mxu0 %v4032_v44 }
0x1cae   :  { %3344 = vmatmul.mubr.msk.f32.vlgmr.msra.gmra.mrb[20].mxu1 %vm90_vm2, %v2062_v46 }
0x1caf   :  { %3761 = vmatpush1.bf16.msra.mxu1 %v4549_v36  ;;  %2449 = vmatprep.mubr.f32.mxu1 %v4029_v4 }
0x1cb0   :  { %3763 = vmatprep.subr.bf16.mxu1 %v4551_v39 }
0x1cb3   :  { %3765 = vmatpush1.bf16.msra.mxu1 %v4567_v50 }
0x1cb4   :  { %3767 = vmatprep.subr.bf16.mxu1 %v4571_v51 }
0x1cb7   :  { %3769 = vmatpush1.bf16.msra.mxu1 %v4586_v0 }
0x1cb8   :  { %3771 = vmatprep.subr.bf16.mxu1 %v4589_v56 }
0x1cbb   :  { %3773 = vmatpush1.bf16.msra.mxu1 %v4598_v5 }
0x1cbc   :  { %3787 = vmatprep.subr.bf16.mxu1 %v4413_v48 }
0x1d71   :  { %v2132_v54 = vpop.f32.mrb[18].mxu1  ;;  %v2203_v57 = vpop.f32.mrb[20].mxu0 }
0x1d72   :  { %v2134_v60 = vpop.f32.mrb[19].mxu1  ;;  %v2205_v63 = vpop.f32.mrb[21].mxu0  ;;  %v2280_v19 = vadd.f32 %v2203_v57, %v4822_v29 }
0x1d73   :  { %v2281_v47 = vadd.f32 %v2205_v63, %v4800_v16 }
0x1d74   :  { %v4886_v2 = vadd.f32 %v2280_v19, %v4690_v24 }
0x1d75   :  { %v4864_v13 = vadd.f32 %v2281_v47, %v4660_v28 }
0x1d76   :  { %v2284_v42 = vadd.f32 %v4886_v2, %v2132_v54 }
0x1d77   :  { %v2285_v1 = vadd.f32 %v4864_v13, %v2134_v60 }
0x1d79   :  { %v2287_v6 = vmul.f32 %v2285_v1, %v4088_v14 }
0x1d7b   :  { %4002 = vtanh.f32 %v2287_v6 }
0x1d81   :  { %v2274_v27 = vpop.f32.mrb[20].mxu1 }
0x1d82   :  { %v2278_v9 = vadd.f32 %v2274_v27, %v4672_v53  ;;  %v3345_v11 = vpop.f32.mrb[21].mxu1 }
0x1d84   :  { %v4870_v10 = vadd.f32 %v2278_v9, %v4806_v21  ;;  %3141 = vst.msk [vmem:[%s5058_s4 + $0x18] sm:$0xff] %vm180_vm1, %v2278_v9  ;;  %v2286_v21 = vmul.f32 0.5, %v2284_v42 }
0x1d85   :  { %v4003_v16 = vpop.eup %4002 }
0x1d86   :  { %3133 = vst.msk [vmem:[%s5059_s3 + $0x18] sm:$0xff] %vm180_vm1, %v4870_v10  ;;  %v2291_v17 = vmul.f32 %v4003_v16, %v4088_v14  ;;  %4004 = vtanh.f32 %v2286_v21 }
0x1d88   :  { %v2293_v33 = vadd.f32 %v2291_v17, %v4094_v20 }
0x1d8a   :  { %2296 = vrot.lane.b32.xlu1 %v2293_v33, %s4031_s21 }
0x1d90   :  { %v4005_v22 = vpop.eup %4004 }
0x1d91   :  { %v2290_v25 = vmul.f32 0.5, %v4005_v22 }
0x1d93   :  { %v2292_v23 = vadd.f32 0.5, %v2290_v25 }
0x1d95   :  { %v2294_v34 = vmul.f32 %v2292_v23, %v4827_v41 }
0x1dfc   :  { %v2297_v26 = vpop.permute.xlu1 %2296 }
0x1dfd   :  { %v2299_v31 = vmul.f32 %v2297_v26, %v2292_v23 }
0x1dff   :  { %2301 = vrot.lane.b32.xlu0 %v2299_v31, %s4031_s21 }
0x1e71   :  { %v2302_v30 = vpop.permute.xlu0 %2301 }
0x1e72   :  { %v4891_v35 = vadd.f32 %v2302_v30, %v2294_v34 }
0x1e74   :  { %4006 = vtanh.f32 %v4891_v35 }
0x1e7e   :  { %v4007_v29 = vpop.eup %4006 }
0x1e7f   :  { %2307 = vrot.lane.b32.xlu1 %v4007_v29, %s4031_s21 }
0x1ef1   :  { %v2308_v52 = vpop.permute.xlu1 %2307 }
0x1ef2   :  { %v2310_v58 = vmul.f32 %v2308_v52, %v2293_v33 }
0x1ef4   :  { %3188 = vmatmul.mubr.msk.f32.vlgmr.msra.gmra.mrb[22].mxu0 %vm90_vm2, %v2310_v58  ;;  %3189 = vmatmul.mubr.msk.f32.vlgmr.msra.gmra.mrb[22].mxu1 %vm90_vm2, %v2310_v58 }
0x1ef5   :  { %3776 = vmatpush3.bf16.msra.mxu0 %v4608_v7  ;;  %3362 = vmatprep.mubr.msk.f32.mxu0 %vm4033_vm3, %v4029_v4 }
0x1ef6   :  { %3777 = vmatprep.subr.bf16.mxu0 %v4032_v44  ;;  %3789 = vmatpush1.bf16.msra.mxu1 %v4421_v59 }
0x1ef7   :  { %3791 = vmatprep.subr.bf16.mxu1 %v4432_v37  ;;  %2626 = vmatprep.mubr.f32.mxu1 %v4029_v4 }
0x1ef9   :  { %3779 = vmatpush3.bf16.msra.mxu0 %v4619_v15 }
0x1efa   :  { %3780 = vmatprep.subr.bf16.mxu0 %v4032_v44  ;;  %3793 = vmatpush1.bf16.msra.mxu1 %v4440_v40 }
0x1efb   :  { %3795 = vmatprep.subr.bf16.mxu1 %v4450_v45 }
0x1efd   :  { %3782 = vmatpush3.bf16.msra.mxu0 %v4631_v18 }
0x1efe   :  { %3783 = vmatprep.subr.bf16.mxu0 %v4032_v44  ;;  %3797 = vmatpush1.bf16.msra.mxu1 %v4458_v49 }
0x1eff   :  { %3799 = vmatprep.subr.bf16.mxu1 %v4468_v55 }
0x1f01   :  { %3785 = vmatpush3.bf16.msra.mxu0 %v4641_v3 }
0x1f02   :  { %3803 = vmatprep.subr.bf16.mxu0 %v4529_v32  ;;  %3801 = vmatpush1.bf16.msra.mxu1 %v4477_v61 }
0x1f03   :  { %3818 = vmatprep.subr.bf16.mxu1 %v4032_v44 }
0x1f04   :  { %3363 = vmatmul.mubr.msk.f32.vlgmr.msra.gmra.mrb[24].mxu0 %vm90_vm2, %v2310_v58 }
0x1f05   :  { %3805 = vmatpush1.bf16.msra.mxu0 %v4549_v36  ;;  %2697 = vmatprep.mubr.f32.mxu0 %v4029_v4 }
0x1f06   :  { %3807 = vmatprep.subr.bf16.mxu0 %v4551_v39 }
0x1f09   :  { %3809 = vmatpush1.bf16.msra.mxu0 %v4567_v50 }
0x1f0a   :  { %3811 = vmatprep.subr.bf16.mxu0 %v4571_v51 }
0x1f0d   :  { %3813 = vmatpush1.bf16.msra.mxu0 %v4586_v0 }
0x1f0e   :  { %3815 = vmatprep.subr.bf16.mxu0 %v4589_v56 }
0x1f11   :  { %3817 = vmatpush1.bf16.msra.mxu0 %v4598_v5 }
0x1f12   :  { %3831 = vmatprep.subr.bf16.mxu0 %v4413_v48 }
0x1fc7   :  { %v2380_v12 = vpop.f32.mrb[22].mxu0  ;;  %v2451_v38 = vpop.f32.mrb[22].mxu1 }
0x1fc8   :  { %v2382_v8 = vpop.f32.mrb[23].mxu0  ;;  %v2453_v41 = vpop.f32.mrb[23].mxu1  ;;  %v2528_v6 = vadd.f32 %v2451_v38, %v4886_v2 }
0x1fc9   :  { %v2529_v62 = vadd.f32 %v2453_v41, %v4864_v13 }
0x1fca   :  { %v2530_v27 = vadd.f32 %v2528_v6, %v4690_v24 }
0x1fcb   :  { %v4928_v43 = vadd.f32 %v2529_v62, %v4660_v28 }
0x1fcc   :  { %v2532_v9 = vadd.f32 %v2530_v27, %v2380_v12 }
0x1fcd   :  { %v2533_v46 = vadd.f32 %v4928_v43, %v2382_v8 }
0x1fce   :  { %v2534_v11 = vmul.f32 0.5, %v2532_v9 }
0x1fcf   :  { %v2535_v54 = vmul.f32 %v2533_v46, %v4088_v14 }
0x1fd1   :  { %4008 = vtanh.f32 %v2535_v54 }
0x1fd2   :  { %4010 = vtanh.f32 %v2534_v11 }
0x1fd7   :  { %v2522_v57 = vpop.f32.mrb[24].mxu0 }
0x1fd8   :  { %v2526_v60 = vadd.f32 %v2522_v57, %v4672_v53  ;;  %v3364_v63 = vpop.f32.mrb[25].mxu0 }
0x1fda   :  { %v4934_v48 = vadd.f32 %v2526_v60, %v4870_v10  ;;  %3142 = vst.msk [vmem:[%s5058_s4 + $0x20] sm:$0xff] %vm180_vm1, %v2526_v60 }
0x1fdb   :  { %v4009_v47 = vpop.eup %4008 }
0x1fdc   :  { %3134 = vst.msk [vmem:[%s5059_s3 + $0x20] sm:$0xff] %vm180_vm1, %v4934_v48  ;;  %v2539_v13 = vmul.f32 %v4009_v47, %v4088_v14  ;;  %v4011_v10 = vpop.eup %4010 }
0x1fdd   :  { %v2538_v16 = vmul.f32 0.5, %v4011_v10 }
0x1fde   :  { %v2541_v1 = vadd.f32 %v2539_v13, %v4094_v20 }
0x1fdf   :  { %v2540_v17 = vadd.f32 0.5, %v2538_v16 }
0x1fe0   :  { %2544 = vrot.lane.b32.xlu0 %v2541_v1, %s4031_s21 }
0x1fe1   :  { %v2542_v42 = vmul.f32 %v2540_v17, %v4891_v35 }
0x2052   :  { %v2545_v33 = vpop.permute.xlu0 %2544 }
0x2053   :  { %v2547_v19 = vmul.f32 %v2545_v33, %v2540_v17 }
0x2055   :  { %2549 = vrot.lane.b32.xlu1 %v2547_v19, %s4031_s21 }
0x20c7   :  { %v2550_v21 = vpop.permute.xlu1 %2549 }
0x20c8   :  { %v4952_v22 = vadd.f32 %v2550_v21, %v2542_v42 }
0x20ca   :  { %4012 = vtanh.f32 %v4952_v22 }
0x20d4   :  { %v4013_v2 = vpop.eup %4012 }
0x20d5   :  { %2555 = vrot.lane.b32.xlu0 %v4013_v2, %s4031_s21 }
0x2147   :  { %v2556_v25 = vpop.permute.xlu0 %2555 }
0x2148   :  { %v2558_v23 = vmul.f32 %v2556_v25, %v2541_v1 }
0x214a   :  { %3191 = vmatmul.mubr.msk.f32.vlgmr.msra.gmra.mrb[24].mxu1 %vm90_vm2, %v2558_v23  ;;  %3192 = vmatmul.mubr.msk.f32.vlgmr.msra.gmra.mrb[26].mxu0 %vm90_vm2, %v2558_v23 }
0x214b   :  { %3820 = vmatpush3.bf16.msra.mxu1 %v4608_v7  ;;  %3381 = vmatprep.mubr.msk.f32.mxu1 %vm4033_vm3, %v4029_v4 }
0x214c   :  { %3821 = vmatprep.subr.bf16.mxu1 %v4032_v44  ;;  %3833 = vmatpush1.bf16.msra.mxu0 %v4421_v59 }
0x214d   :  { %3835 = vmatprep.subr.bf16.mxu0 %v4432_v37  ;;  %2874 = vmatprep.mubr.f32.mxu0 %v4029_v4 }
0x214f   :  { %3823 = vmatpush3.bf16.msra.mxu1 %v4619_v15 }
0x2150   :  { %3824 = vmatprep.subr.bf16.mxu1 %v4032_v44  ;;  %3837 = vmatpush1.bf16.msra.mxu0 %v4440_v40 }
0x2151   :  { %3839 = vmatprep.subr.bf16.mxu0 %v4450_v45 }
0x2153   :  { %3826 = vmatpush3.bf16.msra.mxu1 %v4631_v18 }
0x2154   :  { %3827 = vmatprep.subr.bf16.mxu1 %v4032_v44  ;;  %3841 = vmatpush1.bf16.msra.mxu0 %v4458_v49 }
0x2155   :  { %3843 = vmatprep.subr.bf16.mxu0 %v4468_v55 }
0x2157   :  { %3829 = vmatpush3.bf16.msra.mxu1 %v4641_v3 }
0x2158   :  { %3862 = vmatprep.subr.bf16.mxu1 %v4032_v44  ;;  %3845 = vmatpush1.bf16.msra.mxu0 %v4477_v61 }
0x2159   :  { %3847 = vmatprep.subr.bf16.mxu0 %v4529_v32 }
0x215a   :  { %3382 = vmatmul.mubr.msk.f32.vlgmr.msra.gmra.mrb[26].mxu1 %vm90_vm2, %v2558_v23 }
0x215b   :  { %3864 = vmatpush3.bf16.msra.mxu1 %v4608_v7  ;;  %3400 = vmatprep.mubr.msk.f32.mxu1 %vm4033_vm3, %v4029_v4 }
0x215c   :  { %3865 = vmatprep.subr.bf16.mxu1 %v4032_v44 }
0x215f   :  { %3867 = vmatpush3.bf16.msra.mxu1 %v4619_v15 }
0x2160   :  { %3868 = vmatprep.subr.bf16.mxu1 %v4032_v44 }
0x2163   :  { %3870 = vmatpush3.bf16.msra.mxu1 %v4631_v18 }
0x2164   :  { %3871 = vmatprep.subr.bf16.mxu1 %v4032_v44 }
0x2167   :  { %3873 = vmatpush3.bf16.msra.mxu1 %v4641_v3 }
0x2168   :  { %3874 = vmatprep.subr.bf16.mxu1 %v4032_v44 }
0x221d   :  { %v2628_v59 = vpop.f32.mrb[24].mxu1  ;;  %v2699_v37 = vpop.f32.mrb[26].mxu0 }
0x221e   :  { %v2776_v40 = vadd.f32 %v2699_v37, %v2530_v27  ;;  %v2630_v45 = vpop.f32.mrb[25].mxu1  ;;  %v2701_v49 = vpop.f32.mrb[27].mxu0 }
0x221f   :  { %v2777_v55 = vadd.f32 %v2701_v49, %v4928_v43 }
0x2220   :  { %v2778_v61 = vadd.f32 %v2776_v40, %v4690_v24 }
0x2221   :  { %v2779_v32 = vadd.f32 %v2777_v55, %v4660_v28 }
0x2222   :  { %v2780_v26 = vadd.f32 %v2778_v61, %v2628_v59 }
0x2223   :  { %v2781_v31 = vadd.f32 %v2779_v32, %v2630_v45 }
0x2224   :  { %v2782_v8 = vmul.f32 0.5, %v2780_v26 }
0x2225   :  { %v2783_v34 = vmul.f32 %v2781_v31, %v4088_v14 }
0x2227   :  { %4014 = vtanh.f32 %v2783_v34 }
0x2228   :  { %4016 = vtanh.f32 %v2782_v8 }
0x222d   :  { %v2770_v30 = vpop.f32.mrb[26].mxu1 }
0x222e   :  { %v2774_v35 = vadd.f32 %v2770_v30, %v4672_v53  ;;  %v3383_v29 = vpop.f32.mrb[27].mxu1 }
0x2230   :  { %v2775_v52 = vadd.f32 %v2774_v35, %v4934_v48  ;;  %3143 = vst.msk [vmem:[%s5058_s4 + $0x28] sm:$0xff] %vm180_vm1, %v2774_v35 }
0x2231   :  { %v4015_v58 = vpop.eup %4014 }
0x2232   :  { %3135 = vst.msk [vmem:[%s5059_s3 + $0x28] sm:$0xff] %vm180_vm1, %v2775_v52  ;;  %v2787_v12 = vmul.f32 %v4015_v58, %v4088_v14  ;;  %v4017_v41 = vpop.eup %4016 }
0x2233   :  { %v2786_v62 = vmul.f32 0.5, %v4017_v41 }
0x2234   :  { %v2789_v38 = vadd.f32 %v2787_v12, %v4094_v20 }
0x2235   :  { %v2788_v43 = vadd.f32 0.5, %v2786_v62 }
0x2236   :  { %2792 = vrot.lane.b32.xlu1 %v2789_v38, %s4031_s21 }
0x2237   :  { %v2790_v57 = vmul.f32 %v2788_v43, %v4952_v22 }
0x22a8   :  { %v2793_v46 = vpop.permute.xlu1 %2792 }
0x22a9   :  { %v2795_v54 = vmul.f32 %v2793_v46, %v2788_v43 }
0x22ab   :  { %2797 = vrot.lane.b32.xlu0 %v2795_v54, %s4031_s21 }
0x231d   :  { %v2798_v60 = vpop.permute.xlu0 %2797 }
0x231e   :  { %v2800_v63 = vadd.f32 %v2798_v60, %v2790_v57 }
0x2320   :  { %4018 = vtanh.f32 %v2800_v63 }
0x232a   :  { %v4019_v48 = vpop.eup %4018 }
0x232b   :  { %2803 = vrot.lane.b32.xlu1 %v4019_v48, %s4031_s21 }
0x239d   :  { %v2804_v47 = vpop.permute.xlu1 %2803 }
0x239e   :  { %v2806_v13 = vmul.f32 %v2804_v47, %v2789_v38 }
0x23a0   :  { %3194 = vmatmul.mubr.msk.f32.vlgmr.msra.gmra.mrb[28].mxu0 %vm90_vm2, %v2806_v13  ;;  %3401 = vmatmul.mubr.msk.f32.vlgmr.msra.gmra.mrb[28].mxu1 %vm90_vm2, %v2806_v13 }
0x23a1   :  { %3849 = vmatpush1.bf16.msra.mxu0 %v4549_v36  ;;  %2945 = vmatprep.mubr.f32.mxu0 %v4029_v4 }
0x23a2   :  { %3851 = vmatprep.subr.bf16.mxu0 %v4551_v39  ;;  %3876 = vmatpush3.bf16.msra.mxu1 %v4608_v7 }
0x23a3   :  { %3877 = vmatprep.subr.bf16.mxu1 %v4032_v44  ;;  %3419 = vmatprep.mubr.msk.f32.mxu1 %vm4033_vm3, %v4029_v4 }
0x23a5   :  { %3853 = vmatpush1.bf16.msra.mxu0 %v4567_v50 }
0x23a6   :  { %3855 = vmatprep.subr.bf16.mxu0 %v4571_v51  ;;  %3879 = vmatpush3.bf16.msra.mxu1 %v4619_v15 }
0x23a7   :  { %3880 = vmatprep.subr.bf16.mxu1 %v4032_v44 }
0x23a9   :  { %3857 = vmatpush1.bf16.msra.mxu0 %v4586_v0  ;;  %v3902_v0 = vadd.f32 %v2779_v32, %v4660_v28 }
0x23aa   :  { %3859 = vmatprep.subr.bf16.mxu0 %v4589_v56  ;;  %3882 = vmatpush3.bf16.msra.mxu1 %v4631_v18 }
0x23ab   :  { %3883 = vmatprep.subr.bf16.mxu1 %v4032_v44  ;;  %v3900_v44 = vadd.f32 %v2778_v61, %v4690_v24 }
0x23ad   :  { %3861 = vmatpush1.bf16.msra.mxu0 %v4598_v5 }
0x23ae   :  { %3885 = vmatpush3.bf16.msra.mxu1 %v4641_v3 }
0x23b0   :  { %3195 = vmatmul.mubr.msk.f32.vlgmr.msra.gmra.mrb[28].mxu0 %vm90_vm2, %v2806_v13 }
0x2473   :  { %v3018_v4 = vpop.f32.mrb[28].mxu1 }
0x2474   :  { %v3022_v36 = vadd.f32 %v3018_v4, %v4672_v53  ;;  %v3402_v39 = vpop.f32.mrb[29].mxu1 }
0x2476   :  { %v3023_v50 = vadd.f32 %v3022_v36, %v2775_v52  ;;  %3144 = vst.msk [vmem:[%s5058_s4 + $0x30] sm:$0xff] %vm180_vm1, %v3022_v36 }
0x2478   :  { %3136 = vst.msk [vmem:[%s5059_s3 + $0x30] sm:$0xff] %vm180_vm1, %v3023_v50 }
0x2483   :  { %v2947_v51 = vpop.f32.mrb[28].mxu0 }
0x2484   :  { %v3901_v56 = vadd.f32 %v3900_v44, %v2947_v51  ;;  %v2949_v5 = vpop.f32.mrb[29].mxu0 }
0x2485   :  { %v3903_v7 = vadd.f32 %v3902_v0, %v2949_v5 }
0x2486   :  { %v3030_v6 = vmul.f32 0.5, %v3901_v56 }
0x2487   :  { %v3031_v15 = vmul.f32 %v3903_v7, %v4088_v14 }
0x2489   :  { %4020 = vtanh.f32 %v3031_v15 }
0x248a   :  { %4022 = vtanh.f32 %v3030_v6 }
0x2493   :  { %v4021_v18 = vpop.eup %4020 }
0x2494   :  { %v3035_v3 = vmul.f32 %v4021_v18, %v4088_v14  ;;  %v4023_v27 = vpop.eup %4022 }
0x2495   :  { %v3034_v24 = vmul.f32 0.5, %v4023_v27 }
0x2496   :  { %v3037_v1 = vadd.f32 %v3035_v3, %v4094_v20 }
0x2497   :  { %v3036_v9 = vadd.f32 0.5, %v3034_v24 }
0x2498   :  { %3040 = vrot.lane.b32.xlu0 %v3037_v1, %s4031_s21 }
0x2499   :  { %v3038_v10 = vmul.f32 %v3036_v9, %v2800_v63 }
0x250a   :  { %v3041_v11 = vpop.permute.xlu0 %3040 }
0x250b   :  { %v3043_v28 = vmul.f32 %v3041_v11, %v3036_v9 }
0x250d   :  { %3045 = vrot.lane.b32.xlu1 %v3043_v28, %s4031_s21 }
0x257f   :  { %v3046_v16 = vpop.permute.xlu1 %3045 }
0x2580   :  { %v3048_v17 = vadd.f32 %v3046_v16, %v3038_v10 }
0x2582   :  { %4024 = vtanh.f32 %v3048_v17 }
0x258c   :  { %v4025_v33 = vpop.eup %4024 }
0x258d   :  { %3051 = vrot.lane.b32.xlu0 %v4025_v33, %s4031_s21 }
0x25ff   :  { %v3052_v14 = vpop.permute.xlu0 %3051 }
0x2600   :  { %v3054_v20 = vmul.f32 %v3052_v14, %v3037_v1 }
0x2602   :  { %3420 = vmatmul.mubr.msk.f32.vlgmr.msra.gmra.mrb[30].mxu1 %vm90_vm2, %v3054_v20 }
0x26d5   :  { %v3124_v19 = vpop.f32.mrb[30].mxu1 }
0x26d6   :  { %v3128_v42 = vadd.f32 %v3124_v19, %v4672_v53  ;;  %v3421_v21 = vpop.f32.mrb[31].mxu1 }
0x26d8   :  { %v3129_v22 = vadd.f32 %v3128_v42, %v3023_v50  ;;  %3145 = vst.msk [vmem:[%s5058_s4 + $0x38] sm:$0xff] %vm180_vm1, %v3128_v42 }
0x26da   :  { %3137 = vst.msk [vmem:[%s5059_s3 + $0x38] sm:$0xff] %vm180_vm1, %v3129_v22 }

</bundles_post_ra>
